<compile_context>
chip_gen: v7x
topology: tpu7x:2x2x1
jax: 0.10.0
libtpu: 0.0.40
codegen_flags: <defaults>
</compile_context>

<pallas_src>
import functools

import jax
import jax.numpy as jnp
from jax.experimental import pallas as pl
from jax.experimental.pallas import tpu as pltpu


# ----------------------------- small helpers -------------------------------

def _round_up(x, m):
    return (x + m - 1) // m * m


def _choose_tile_m(m_pad, max_tile=512):
    """Largest multiple of 128 that is <= max_tile and divides m_pad."""
    start = (min(max_tile, m_pad) // 128) * 128
    for t in range(start, 127, -128):
        if m_pad % t == 0:
            return t
    return 128  # unreachable: m_pad is a multiple of 128


# ----------------------------- Pallas kernels ------------------------------

def _convT_kernel(w_ref, b_ref, p_ref, o_ref, *, relu):
    # w_ref: (Cout, K) bf16, b_ref: (Cout, 1) f32, p_ref: (K, TM) bf16,
    # o_ref: (Cout, TM).  out^T = W @ patches^T  (lane-dense output).
    acc = jnp.dot(w_ref[...], p_ref[...], preferred_element_type=jnp.float32)
    acc = acc + b_ref[...]
    if relu:
        acc = jnp.maximum(acc, 0.0)
    o_ref[...] = acc.astype(o_ref.dtype)


def _headT_kernel(w_ref, b_ref, p_ref, o_ref):
    # Final conv (1x1 spatial) + flatten + log_softmax over classes (axis 0).
    logits = jnp.dot(w_ref[...], p_ref[...], preferred_element_type=jnp.float32)
    logits = logits + b_ref[...]
    m = jnp.max(logits, axis=0, keepdims=True)
    s = logits - m
    lse = jnp.log(jnp.sum(jnp.exp(s), axis=0, keepdims=True))
    o_ref[...] = (s - lse).astype(o_ref.dtype)


def _pallas_convT_matmul(wf, b2, patches, *, relu, head, tile_max=512):
    """wf: (Cout, K) bf16, b2: (Cout, 1) f32, patches: (K, M_pad) bf16."""
    cout, K = wf.shape
    _, m_pad = patches.shape
    tile_m = _choose_tile_m(m_pad, tile_max)
    grid = (m_pad // tile_m,)
    kernel = _headT_kernel if head else functools.partial(_convT_kernel, relu=relu)
    out_dtype = jnp.float32 if head else jnp.bfloat16

    flops = 2 * cout * K * m_pad
    bytes_accessed = int(
        patches.size * patches.dtype.itemsize
        + wf.size * wf.dtype.itemsize
        + b2.size * 4
        + cout * m_pad * jnp.dtype(out_dtype).itemsize)
    transcendentals = cout * m_pad if head else 0

    return pl.pallas_call(
        kernel,
        out_shape=jax.ShapeDtypeStruct((cout, m_pad), out_dtype),
        grid=grid,
        in_specs=[
            pl.BlockSpec((cout, K), lambda i: (0, 0)),      # weights (resident)
            pl.BlockSpec((cout, 1), lambda i: (0, 0)),      # bias    (resident)
            pl.BlockSpec((K, tile_m), lambda i: (0, i)),    # patches (pipelined)
        ],
        out_specs=pl.BlockSpec((cout, tile_m), lambda i: (0, i)),
        compiler_params=pltpu.CompilerParams(
            dimension_semantics=("parallel",)),
        cost_estimate=pl.CostEstimate(
            flops=flops, transcendentals=transcendentals,
            bytes_accessed=bytes_accessed),
    )(wf, b2, patches)


# ------------------------------- JAX glue ----------------------------------

def _im2colT(x, kh, kw, stride, pad):
    """x: (C, N, H, W) -> patches^T (KH*KW*C, N*OH*OW), rows ordered (kh, kw, c)."""
    if pad:
        x = jnp.pad(x, ((0, 0), (0, 0), (pad, pad), (pad, pad)))
    C, N, H, W = x.shape
    oh = (H - kh) // stride + 1
    ow = (W - kw) // stride + 1
    cols = []
    for i in range(kh):
        for j in range(kw):
            cols.append(x[:, :, i:i + stride * oh:stride, j:j + stride * ow:stride])
    p = jnp.concatenate(cols, axis=0)            # (KH*KW*C, N, OH, OW)
    return p.reshape(kh * kw * C, N * oh * ow), oh, ow


def _conv_layer(x, w, b, stride, pad, *, relu, head=False):
    """x: (Cin, N, H, W) bf16 (CNHW); w: (Cout, Cin, KH, KW); b: (Cout,).

    Returns (Cout, N, OH, OW): bf16 for hidden layers, f32 log-probs for head.
    """
    cout, cin, kh, kw = w.shape
    N = x.shape[1]
    patches, oh, ow = _im2colT(x, kh, kw, stride, pad)       # (K, M) bf16
    K, M = patches.shape
    m_pad = _round_up(M, 128)
    if m_pad != M:
        patches = jnp.pad(patches, ((0, 0), (0, m_pad - M)))
    # PyTorch weight (Cout, Cin, KH, KW) -> (Cout, KH*KW*Cin) to match row order.
    wf = w.transpose(0, 2, 3, 1).reshape(cout, K).astype(jnp.bfloat16)
    b2 = b.reshape(cout, 1).astype(jnp.float32)
    out = _pallas_convT_matmul(wf, b2, patches, relu=relu, head=head)
    return out[:, :M].reshape(cout, N, oh, ow)


def convnet_forward(x, params):
    """x: (N, 1, 28, 28) float32, NCHW. Returns log-probs (N, 10) float32."""
    (w1, b1), (w2, b2), (w3, b3), (w4, b4), (w5, b5) = params
    # NCHW -> CNHW once; bf16 feeds the MXU (accumulation stays f32 in-kernel).
    a = x.transpose(1, 0, 2, 3).astype(jnp.bfloat16)          # (1,  N, 28, 28)
    a = _conv_layer(a, w1, b1, 1, 0, relu=True)               # (8,  N, 24, 24)
    a = _conv_layer(a, w2, b2, 2, 1, relu=True)               # (16, N, 12, 12)
    a = _conv_layer(a, w3, b3, 1, 0, relu=True)               # (32, N,  8,  8)
    a = _conv_layer(a, w4, b4, 2, 1, relu=True)               # (64, N,  4,  4)
    logp = _conv_layer(a, w5, b5, 1, 0, relu=False, head=True)  # (10, N, 1, 1)
    return logp.reshape(10, -1).T                             # (N, 10)


# --------------------------- pure-JAX reference -----------------------------

def _reference_forward(x, params):
    """lax.conv reference with the same bf16-input / f32-accumulate numerics."""
    def conv(a, w, b, stride, pad):
        out = jax.lax.conv_general_dilated(
            a.astype(jnp.bfloat16), w.astype(jnp.bfloat16),
            window_strides=(stride, stride),
            padding=[(pad, pad), (pad, pad)],
            dimension_numbers=("NCHW", "OIHW", "NCHW"),
            preferred_element_type=jnp.float32)
        return out + b.reshape(1, -1, 1, 1)

    (w1, b1), (w2, b2), (w3, b3), (w4, b4), (w5, b5) = params
    a = x
    for (w, b, s, p) in [(w1, b1, 1, 0), (w2, b2, 2, 1),
                         (w3, b3, 1, 0), (w4, b4, 2, 1)]:
        a = jax.nn.relu(conv(a, w, b, s, p)).astype(jnp.bfloat16)
    logits = conv(a, w5, b5, 1, 0).reshape(x.shape[0], -1)
    return jax.nn.log_softmax(logits, axis=1)


# --------------------------- parameter creation -----------------------------

def init_params(key):
    """Deterministic init matching the PyTorch layer shapes (nf = 8)."""
    def conv_param(key, cout, cin, k):
        kw_key, kb_key = jax.random.split(key)
        fan_in = cin * k * k
        bound = 1.0 / jnp.sqrt(fan_in)
        w = jax.random.uniform(kw_key, (cout, cin, k, k), jnp.float32, -bound, bound)
        b = jax.random.uniform(kb_key, (cout,), jnp.float32, -bound, bound)
        return w, b

    keys = jax.random.split(key, 5)
    nf = 8
    return [
        conv_param(keys[0], nf * 1, 1, 5),
        conv_param(keys[1], nf * 2, nf * 1, 4),
        conv_param(keys[2], nf * 4, nf * 2, 5),
        conv_param(keys[3], nf * 8, nf * 4, 4),
        conv_param(keys[4], 10, nf * 8, 4),
    ]


# ----------------------------------- main -----------------------------------

if __name__ == "__main__":
    key = jax.random.PRNGKey(0)
    pkey, xkey = jax.random.split(key)
    params = init_params(pkey)
    # ConvNet geometry implies a 28x28 single-channel input (MNIST-like).
    x = jax.random.normal(xkey, (2, 1, 28, 28), dtype=jnp.float32)

    fwd = jax.jit(convnet_forward)
    out = jax.block_until_ready(fwd(x, params))

    assert out.shape == (2, 10), out.shape
    # log_softmax sanity: exp(log-probs) must sum to ~1 per row.
    row_sums = jnp.sum(jnp.exp(out), axis=1)
    assert jnp.allclose(row_sums, 1.0, atol=1e-4), row_sums

    # Cross-check against an XLA conv reference with matched numerics.
    ref = jax.block_until_ready(jax.jit(_reference_forward)(x, params))
    assert jnp.allclose(out, ref, atol=2e-2), float(jnp.max(jnp.abs(out - ref)))

    print("KERNEL_OK")
</pallas_src>

<mosaic_0001>
module attributes {stable_mosaic.version = 11 : i64} {
  func.func @_convT_kernel(%arg0: i32, %arg1: memref<8x25xbf16, #tpu.memory_space<vmem>>, %arg2: memref<8x1xf32, #tpu.memory_space<vmem>>, %arg3: memref<25x384xbf16, #tpu.memory_space<vmem>>, %arg4: memref<8x384xbf16, #tpu.memory_space<vmem>>) attributes {dimension_semantics = [#tpu.dimension_semantics<parallel>], iteration_bounds = array<i64: 3>, scalar_prefetch = 0 : i64, scratch_operands = 0 : i64, tpu.core_type = #tpu.core_type<tc>, window_params = [{pipeline_mode = #tpu.pipeline_mode<synchronous>, transform_indices = @transform_0, window_bounds = array<i64: 8, 25>}, {pipeline_mode = #tpu.pipeline_mode<synchronous>, transform_indices = @transform_1, window_bounds = array<i64: 8, 1>}, {transform_indices = @transform_2, window_bounds = array<i64: 25, 384>}, {transform_indices = @transform_3, window_bounds = array<i64: 8, 384>}]} {
    %c0 = arith.constant 0 : index
    %c0_0 = arith.constant 0 : index
    %0 = vector.load %arg1[%c0, %c0_0] : memref<8x25xbf16, #tpu.memory_space<vmem>>, vector<8x25xbf16>
    %c0_1 = arith.constant 0 : index
    %c0_2 = arith.constant 0 : index
    %1 = vector.load %arg3[%c0_1, %c0_2] : memref<25x384xbf16, #tpu.memory_space<vmem>>, vector<25x384xbf16>
    %cst = arith.constant dense<0.000000e+00> : vector<8x384xf32>
    %2 = tpu.matmul %0, %1, %cst {dimension_numbers = #tpu.dot_dimension_numbers<[1], [0], [0], [1], [0, 0, 1, 1], [], []>} : vector<8x25xbf16>, vector<25x384xbf16>, vector<8x384xf32> -> vector<8x384xf32>
    %c0_3 = arith.constant 0 : index
    %c0_4 = arith.constant 0 : index
    %3 = vector.load %arg2[%c0_3, %c0_4] : memref<8x1xf32, #tpu.memory_space<vmem>>, vector<8x1xf32>
    %4 = vector.broadcast %3 : vector<8x1xf32> to vector<8x384xf32>
    %5 = arith.addf %2, %4 : vector<8x384xf32>
    %cst_5 = arith.constant 0.000000e+00 : f32
    %6 = vector.broadcast %cst_5 : f32 to vector<8x384xf32>
    %7 = arith.maximumf %5, %6 : vector<8x384xf32>
    %8 = arith.truncf %7 : vector<8x384xf32> to vector<8x384xbf16>
    %c0_6 = arith.constant 0 : index
    %c0_7 = arith.constant 0 : index
    %9 = vector.load %arg4[%c0_6, %c0_7] : memref<8x384xbf16, #tpu.memory_space<vmem>>, vector<8x384xbf16>
    tpu.vector_store %arg4[%c0_6, %c0_7], %8 {strides = array<i32>} : memref<8x384xbf16, #tpu.memory_space<vmem>>, vector<8x384xbf16>,
    return
  }
  func.func @transform_0(%arg0: i32) -> (i32, i32) {
    %c0_i32 = arith.constant 0 : i32
    %c0_i32_0 = arith.constant 0 : i32
    %c0_i32_1 = arith.constant 0 : i32
    return %c0_i32, %c0_i32_0 : i32, i32
  }
  func.func @transform_1(%arg0: i32) -> (i32, i32) {
    %c0_i32 = arith.constant 0 : i32
    %c0_i32_0 = arith.constant 0 : i32
    %c0_i32_1 = arith.constant 0 : i32
    return %c0_i32, %c0_i32_0 : i32, i32
  }
  func.func @transform_2(%arg0: i32) -> (i32, i32) {
    %c0_i32 = arith.constant 0 : i32
    %c0_i32_0 = arith.constant 0 : i32
    return %c0_i32, %arg0 : i32, i32
  }
  func.func @transform_3(%arg0: i32) -> (i32, i32) {
    %c0_i32 = arith.constant 0 : i32
    %c0_i32_0 = arith.constant 0 : i32
    return %c0_i32, %arg0 : i32, i32
  }
}

module attributes {stable_mosaic.version = 11 : i64} {
  func.func @_convT_kernel(%arg0: i32, %arg1: memref<16x128xbf16, #tpu.memory_space<vmem>>, %arg2: memref<16x1xf32, #tpu.memory_space<vmem>>, %arg3: memref<128x384xbf16, #tpu.memory_space<vmem>>, %arg4: memref<16x384xbf16, #tpu.memory_space<vmem>>) attributes {dimension_semantics = [#tpu.dimension_semantics<parallel>], iteration_bounds = array<i64: 1>, scalar_prefetch = 0 : i64, scratch_operands = 0 : i64, tpu.core_type = #tpu.core_type<tc>, window_params = [{pipeline_mode = #tpu.pipeline_mode<synchronous>, transform_indices = @transform_0, window_bounds = array<i64: 16, 128>}, {pipeline_mode = #tpu.pipeline_mode<synchronous>, transform_indices = @transform_1, window_bounds = array<i64: 16, 1>}, {transform_indices = @transform_2, window_bounds = array<i64: 128, 384>}, {transform_indices = @transform_3, window_bounds = array<i64: 16, 384>}]} {
    %c0 = arith.constant 0 : index
    %c0_0 = arith.constant 0 : index
    %0 = vector.load %arg1[%c0, %c0_0] : memref<16x128xbf16, #tpu.memory_space<vmem>>, vector<16x128xbf16>
    %c0_1 = arith.constant 0 : index
    %c0_2 = arith.constant 0 : index
    %1 = vector.load %arg3[%c0_1, %c0_2] : memref<128x384xbf16, #tpu.memory_space<vmem>>, vector<128x384xbf16>
    %cst = arith.constant dense<0.000000e+00> : vector<16x384xf32>
    %2 = tpu.matmul %0, %1, %cst {dimension_numbers = #tpu.dot_dimension_numbers<[1], [0], [0], [1], [0, 0, 1, 1], [], []>} : vector<16x128xbf16>, vector<128x384xbf16>, vector<16x384xf32> -> vector<16x384xf32>
    %c0_3 = arith.constant 0 : index
    %c0_4 = arith.constant 0 : index
    %3 = vector.load %arg2[%c0_3, %c0_4] : memref<16x1xf32, #tpu.memory_space<vmem>>, vector<16x1xf32>
    %4 = vector.broadcast %3 : vector<16x1xf32> to vector<16x384xf32>
    %5 = arith.addf %2, %4 : vector<16x384xf32>
    %cst_5 = arith.constant 0.000000e+00 : f32
    %6 = vector.broadcast %cst_5 : f32 to vector<16x384xf32>
    %7 = arith.maximumf %5, %6 : vector<16x384xf32>
    %8 = arith.truncf %7 : vector<16x384xf32> to vector<16x384xbf16>
    %c0_6 = arith.constant 0 : index
    %c0_7 = arith.constant 0 : index
    %9 = vector.load %arg4[%c0_6, %c0_7] : memref<16x384xbf16, #tpu.memory_space<vmem>>, vector<16x384xbf16>
    tpu.vector_store %arg4[%c0_6, %c0_7], %8 {strides = array<i32>} : memref<16x384xbf16, #tpu.memory_space<vmem>>, vector<16x384xbf16>,
    return
  }
  func.func @transform_0(%arg0: i32) -> (i32, i32) {
    %c0_i32 = arith.constant 0 : i32
    %c0_i32_0 = arith.constant 0 : i32
    %c0_i32_1 = arith.constant 0 : i32
    return %c0_i32, %c0_i32_0 : i32, i32
  }
  func.func @transform_1(%arg0: i32) -> (i32, i32) {
    %c0_i32 = arith.constant 0 : i32
    %c0_i32_0 = arith.constant 0 : i32
    %c0_i32_1 = arith.constant 0 : i32
    return %c0_i32, %c0_i32_0 : i32, i32
  }
  func.func @transform_2(%arg0: i32) -> (i32, i32) {
    %c0_i32 = arith.constant 0 : i32
    %c0_i32_0 = arith.constant 0 : i32
    return %c0_i32, %arg0 : i32, i32
  }
  func.func @transform_3(%arg0: i32) -> (i32, i32) {
    %c0_i32 = arith.constant 0 : i32
    %c0_i32_0 = arith.constant 0 : i32
    return %c0_i32, %arg0 : i32, i32
  }
}

module attributes {stable_mosaic.version = 11 : i64} {
  func.func @_convT_kernel(%arg0: i32, %arg1: memref<32x400xbf16, #tpu.memory_space<vmem>>, %arg2: memref<32x1xf32, #tpu.memory_space<vmem>>, %arg3: memref<400x128xbf16, #tpu.memory_space<vmem>>, %arg4: memref<32x128xbf16, #tpu.memory_space<vmem>>) attributes {dimension_semantics = [#tpu.dimension_semantics<parallel>], iteration_bounds = array<i64: 1>, scalar_prefetch = 0 : i64, scratch_operands = 0 : i64, tpu.core_type = #tpu.core_type<tc>, window_params = [{pipeline_mode = #tpu.pipeline_mode<synchronous>, transform_indices = @transform_0, window_bounds = array<i64: 32, 400>}, {pipeline_mode = #tpu.pipeline_mode<synchronous>, transform_indices = @transform_1, window_bounds = array<i64: 32, 1>}, {transform_indices = @transform_2, window_bounds = array<i64: 400, 128>}, {transform_indices = @transform_3, window_bounds = array<i64: 32, 128>}]} {
    %c0 = arith.constant 0 : index
    %c0_0 = arith.constant 0 : index
    %0 = vector.load %arg1[%c0, %c0_0] : memref<32x400xbf16, #tpu.memory_space<vmem>>, vector<32x400xbf16>
    %c0_1 = arith.constant 0 : index
    %c0_2 = arith.constant 0 : index
    %1 = vector.load %arg3[%c0_1, %c0_2] : memref<400x128xbf16, #tpu.memory_space<vmem>>, vector<400x128xbf16>
    %cst = arith.constant dense<0.000000e+00> : vector<32x128xf32>
    %2 = tpu.matmul %0, %1, %cst {dimension_numbers = #tpu.dot_dimension_numbers<[1], [0], [0], [1], [0, 0, 1, 1], [], []>} : vector<32x400xbf16>, vector<400x128xbf16>, vector<32x128xf32> -> vector<32x128xf32>
    %c0_3 = arith.constant 0 : index
    %c0_4 = arith.constant 0 : index
    %3 = vector.load %arg2[%c0_3, %c0_4] : memref<32x1xf32, #tpu.memory_space<vmem>>, vector<32x1xf32>
    %4 = vector.broadcast %3 : vector<32x1xf32> to vector<32x128xf32>
    %5 = arith.addf %2, %4 : vector<32x128xf32>
    %cst_5 = arith.constant 0.000000e+00 : f32
    %6 = vector.broadcast %cst_5 : f32 to vector<32x128xf32>
    %7 = arith.maximumf %5, %6 : vector<32x128xf32>
    %8 = arith.truncf %7 : vector<32x128xf32> to vector<32x128xbf16>
    %c0_6 = arith.constant 0 : index
    %c0_7 = arith.constant 0 : index
    %9 = vector.load %arg4[%c0_6, %c0_7] : memref<32x128xbf16, #tpu.memory_space<vmem>>, vector<32x128xbf16>
    tpu.vector_store %arg4[%c0_6, %c0_7], %8 {strides = array<i32>} : memref<32x128xbf16, #tpu.memory_space<vmem>>, vector<32x128xbf16>,
    return
  }
  func.func @transform_0(%arg0: i32) -> (i32, i32) {
    %c0_i32 = arith.constant 0 : i32
    %c0_i32_0 = arith.constant 0 : i32
    %c0_i32_1 = arith.constant 0 : i32
    return %c0_i32, %c0_i32_0 : i32, i32
  }
  func.func @transform_1(%arg0: i32) -> (i32, i32) {
    %c0_i32 = arith.constant 0 : i32
    %c0_i32_0 = arith.constant 0 : i32
    %c0_i32_1 = arith.constant 0 : i32
    return %c0_i32, %c0_i32_0 : i32, i32
  }
  func.func @transform_2(%arg0: i32) -> (i32, i32) {
    %c0_i32 = arith.constant 0 : i32
    %c0_i32_0 = arith.constant 0 : i32
    return %c0_i32, %arg0 : i32, i32
  }
  func.func @transform_3(%arg0: i32) -> (i32, i32) {
    %c0_i32 = arith.constant 0 : i32
    %c0_i32_0 = arith.constant 0 : i32
    return %c0_i32, %arg0 : i32, i32
  }
}

module attributes {stable_mosaic.version = 11 : i64} {
  func.func @_convT_kernel(%arg0: i32, %arg1: memref<64x512xbf16, #tpu.memory_space<vmem>>, %arg2: memref<64x1xf32, #tpu.memory_space<vmem>>, %arg3: memref<512x128xbf16, #tpu.memory_space<vmem>>, %arg4: memref<64x128xbf16, #tpu.memory_space<vmem>>) attributes {dimension_semantics = [#tpu.dimension_semantics<parallel>], iteration_bounds = array<i64: 1>, scalar_prefetch = 0 : i64, scratch_operands = 0 : i64, tpu.core_type = #tpu.core_type<tc>, window_params = [{pipeline_mode = #tpu.pipeline_mode<synchronous>, transform_indices = @transform_0, window_bounds = array<i64: 64, 512>}, {pipeline_mode = #tpu.pipeline_mode<synchronous>, transform_indices = @transform_1, window_bounds = array<i64: 64, 1>}, {transform_indices = @transform_2, window_bounds = array<i64: 512, 128>}, {transform_indices = @transform_3, window_bounds = array<i64: 64, 128>}]} {
    %c0 = arith.constant 0 : index
    %c0_0 = arith.constant 0 : index
    %0 = vector.load %arg1[%c0, %c0_0] : memref<64x512xbf16, #tpu.memory_space<vmem>>, vector<64x512xbf16>
    %c0_1 = arith.constant 0 : index
    %c0_2 = arith.constant 0 : index
    %1 = vector.load %arg3[%c0_1, %c0_2] : memref<512x128xbf16, #tpu.memory_space<vmem>>, vector<512x128xbf16>
    %cst = arith.constant dense<0.000000e+00> : vector<64x128xf32>
    %2 = tpu.matmul %0, %1, %cst {dimension_numbers = #tpu.dot_dimension_numbers<[1], [0], [0], [1], [0, 0, 1, 1], [], []>} : vector<64x512xbf16>, vector<512x128xbf16>, vector<64x128xf32> -> vector<64x128xf32>
    %c0_3 = arith.constant 0 : index
    %c0_4 = arith.constant 0 : index
    %3 = vector.load %arg2[%c0_3, %c0_4] : memref<64x1xf32, #tpu.memory_space<vmem>>, vector<64x1xf32>
    %4 = vector.broadcast %3 : vector<64x1xf32> to vector<64x128xf32>
    %5 = arith.addf %2, %4 : vector<64x128xf32>
    %cst_5 = arith.constant 0.000000e+00 : f32
    %6 = vector.broadcast %cst_5 : f32 to vector<64x128xf32>
    %7 = arith.maximumf %5, %6 : vector<64x128xf32>
    %8 = arith.truncf %7 : vector<64x128xf32> to vector<64x128xbf16>
    %c0_6 = arith.constant 0 : index
    %c0_7 = arith.constant 0 : index
    %9 = vector.load %arg4[%c0_6, %c0_7] : memref<64x128xbf16, #tpu.memory_space<vmem>>, vector<64x128xbf16>
    tpu.vector_store %arg4[%c0_6, %c0_7], %8 {strides = array<i32>} : memref<64x128xbf16, #tpu.memory_space<vmem>>, vector<64x128xbf16>,
    return
  }
  func.func @transform_0(%arg0: i32) -> (i32, i32) {
    %c0_i32 = arith.constant 0 : i32
    %c0_i32_0 = arith.constant 0 : i32
    %c0_i32_1 = arith.constant 0 : i32
    return %c0_i32, %c0_i32_0 : i32, i32
  }
  func.func @transform_1(%arg0: i32) -> (i32, i32) {
    %c0_i32 = arith.constant 0 : i32
    %c0_i32_0 = arith.constant 0 : i32
    %c0_i32_1 = arith.constant 0 : i32
    return %c0_i32, %c0_i32_0 : i32, i32
  }
  func.func @transform_2(%arg0: i32) -> (i32, i32) {
    %c0_i32 = arith.constant 0 : i32
    %c0_i32_0 = arith.constant 0 : i32
    return %c0_i32, %arg0 : i32, i32
  }
  func.func @transform_3(%arg0: i32) -> (i32, i32) {
    %c0_i32 = arith.constant 0 : i32
    %c0_i32_0 = arith.constant 0 : i32
    return %c0_i32, %arg0 : i32, i32
  }
}

module attributes {stable_mosaic.version = 11 : i64} {
  func.func @_headT_kernel(%arg0: i32, %arg1: memref<10x1024xbf16, #tpu.memory_space<vmem>>, %arg2: memref<10x1xf32, #tpu.memory_space<vmem>>, %arg3: memref<1024x128xbf16, #tpu.memory_space<vmem>>, %arg4: memref<10x128xf32, #tpu.memory_space<vmem>>) attributes {dimension_semantics = [#tpu.dimension_semantics<parallel>], iteration_bounds = array<i64: 1>, scalar_prefetch = 0 : i64, scratch_operands = 0 : i64, tpu.core_type = #tpu.core_type<tc>, window_params = [{pipeline_mode = #tpu.pipeline_mode<synchronous>, transform_indices = @transform_0, window_bounds = array<i64: 10, 1024>}, {pipeline_mode = #tpu.pipeline_mode<synchronous>, transform_indices = @transform_1, window_bounds = array<i64: 10, 1>}, {transform_indices = @transform_2, window_bounds = array<i64: 1024, 128>}, {transform_indices = @transform_3, window_bounds = array<i64: 10, 128>}]} {
    %c0 = arith.constant 0 : index
    %c0_0 = arith.constant 0 : index
    %0 = vector.load %arg1[%c0, %c0_0] : memref<10x1024xbf16, #tpu.memory_space<vmem>>, vector<10x1024xbf16>
    %c0_1 = arith.constant 0 : index
    %c0_2 = arith.constant 0 : index
    %1 = vector.load %arg3[%c0_1, %c0_2] : memref<1024x128xbf16, #tpu.memory_space<vmem>>, vector<1024x128xbf16>
    %cst = arith.constant dense<0.000000e+00> : vector<10x128xf32>
    %2 = tpu.matmul %0, %1, %cst {dimension_numbers = #tpu.dot_dimension_numbers<[1], [0], [0], [1], [0, 0, 1, 1], [], []>} : vector<10x1024xbf16>, vector<1024x128xbf16>, vector<10x128xf32> -> vector<10x128xf32>
    %c0_3 = arith.constant 0 : index
    %c0_4 = arith.constant 0 : index
    %3 = vector.load %arg2[%c0_3, %c0_4] : memref<10x1xf32, #tpu.memory_space<vmem>>, vector<10x1xf32>
    %4 = vector.broadcast %3 : vector<10x1xf32> to vector<10x128xf32>
    %5 = arith.addf %2, %4 : vector<10x128xf32>
    %cst_5 = arith.constant dense<0xFF800000> : vector<128xf32>
    %6 = vector.multi_reduction <maximumf>, %5, %cst_5 [0] : vector<10x128xf32> to vector<128xf32>
    %7 = vector.shape_cast %6 : vector<128xf32> to vector<1x128xf32>
    %8 = vector.broadcast %7 : vector<1x128xf32> to vector<10x128xf32>
    %9 = arith.subf %5, %8 : vector<10x128xf32>
    %10 = math.exp %9 : vector<10x128xf32>
    %cst_6 = arith.constant dense<0.000000e+00> : vector<128xf32>
    %11 = vector.multi_reduction <add>, %10, %cst_6 [0] : vector<10x128xf32> to vector<128xf32>
    %12 = vector.shape_cast %11 : vector<128xf32> to vector<1x128xf32>
    %13 = math.log %12 : vector<1x128xf32>
    %14 = vector.broadcast %13 : vector<1x128xf32> to vector<10x128xf32>
    %15 = arith.subf %9, %14 : vector<10x128xf32>
    %c0_7 = arith.constant 0 : index
    %c0_8 = arith.constant 0 : index
    %16 = vector.load %arg4[%c0_7, %c0_8] : memref<10x128xf32, #tpu.memory_space<vmem>>, vector<10x128xf32>
    tpu.vector_store %arg4[%c0_7, %c0_8], %15 {strides = array<i32>} : memref<10x128xf32, #tpu.memory_space<vmem>>, vector<10x128xf32>,
    return
  }
  func.func @transform_0(%arg0: i32) -> (i32, i32) {
    %c0_i32 = arith.constant 0 : i32
    %c0_i32_0 = arith.constant 0 : i32
    %c0_i32_1 = arith.constant 0 : i32
    return %c0_i32, %c0_i32_0 : i32, i32
  }
  func.func @transform_1(%arg0: i32) -> (i32, i32) {
    %c0_i32 = arith.constant 0 : i32
    %c0_i32_0 = arith.constant 0 : i32
    %c0_i32_1 = arith.constant 0 : i32
    return %c0_i32, %c0_i32_0 : i32, i32
  }
  func.func @transform_2(%arg0: i32) -> (i32, i32) {
    %c0_i32 = arith.constant 0 : i32
    %c0_i32_0 = arith.constant 0 : i32
    return %c0_i32, %arg0 : i32, i32
  }
  func.func @transform_3(%arg0: i32) -> (i32, i32) {
    %c0_i32 = arith.constant 0 : i32
    %c0_i32_0 = arith.constant 0 : i32
    return %c0_i32, %arg0 : i32, i32
  }
}

</mosaic_0001>

<bundles_post_ra>
// kernel: convnet_forward.5
= control target key start
LH: loop header
LB: loop body
LE: loop exit
PB: predicated region body
PF: predicated region fallthrough
CT: control target
= control target key end

     0   :  { %s571_s12 = smov 0   ;;  %s573_s13 = smov 0   ;;  %s629_s0 = inlined_call_operand.vmem [shape: bf16[8,25], index: 0, kind: input, shape index: {}]   ;;  %s630_s1 = inlined_call_operand.vmem [shape: f32[8,1], index: 1, kind: input, shape index: {}]   ;;  %s631_s2 = inlined_call_operand.vmem [shape: bf16[25,1152], index: 2, kind: input, shape index: {}]   ;;  %s632_s3 = inlined_call_operand.vmem [shape: bf16[8,1152], index: 3, kind: output, shape index: {}]  }
   0x1   :  { %s575_s14 = smov 0  }
   0x2 LB: > { %s443_s15 = sadd.s32 4294967295, %s545_s14   ;;  %s588_s16 = sadd.s32 1, %s545_s14   ;;  %s545_s14 = sphi %s575_s14, %s635_s14   ;;  %s541_s13 = sphi %s573_s13, %s634_s13   ;;  %s537_s12 = sphi %s571_s12, %s633_s12  }
   0x3   : > { %s59_s17 = ssub.s32 %s545_s14, %s588_s16  ;;  %s62_s18 = sadd.s32 1, %s541_s13 }
   0x4   : > { %p60_p0 = scmp.eq.s32.totalorder %s59_s17, 0  ;;  %p69_p1 = scmp.ne.s32.totalorder %s541_s13, %s537_s12 }
   0x5   : > { %p70_p2 = scmp.eq.s32.totalorder %s545_s14, 0  ;;  %p446_p4 = scmp.ge.s32.totalorder %s545_s14, 3 }
   0x6   : > { %s597_s19 = scalar_select %p60_p0, %s541_s13, %s62_s18  }
   0x7   : > { %p71_p3 = por %p70_p2, %p69_p1  ;;  %127 = sbr.rel (%p446_p4) target bundleno = 23 (0x17), region = 24 }
   0xe   : > { %130 = sbr.rel (!%p71_p3) target bundleno = 23 (0x17), region = 28  ;;  %s132_s20 = sand.u32 (%p71_p3), 1, %s541_s13  }
   0xf   : > { %s470_s21 = smul.u32 (%p71_p3), 12, %s545_s14 }
  0x10   : > { %s484_s22 = smul.u32 (%p71_p3), 48, %s132_s20 }
  0x11   : > { %s137_s25 = scalar_lea.vmem (%p71_p3), %s631_s2, %s470_s21 }
  0x12   : > { %v152_v0 = vld [vmem:[%s137_s25] sm:$0xff] (%p71_p3)  ;;  %v156_v2 = vld [vmem:[%s137_s25 + $0x48] sm:$0xff] (%p71_p3)  ;;  %s134_s26 = scalar_lea.vmem (%p71_p3), [#allocation2], %s484_s22  ;;  %v452_v6 = vld [vmem:[%s137_s25 + $0x50] sm:$0xf] (%p71_p3) }
  0x13   : > { %v154_v1 = vld [vmem:[%s137_s25 + $0x24] sm:$0xff] (%p71_p3)  ;;  %153 = vst [vmem:[%s134_s26] sm:$0xff] (%p71_p3), %v152_v0  ;;  %157 = vst [vmem:[%s134_s26 + $0x18] sm:$0xff] (%p71_p3), %v156_v2  ;;  %v158_v3 = vld [vmem:[%s137_s25 + $0x6c] sm:$0xff] (%p71_p3) }
  0x14   : > { %155 = vst [vmem:[%s134_s26 + $0xc] sm:$0xff] (%p71_p3), %v154_v1  ;;  %v448_v4 = vld [vmem:[%s137_s25 + $0x8] sm:$0xf] (%p71_p3)  ;;  %v450_v5 = vld [vmem:[%s137_s25 + $0x2c] sm:$0xf] (%p71_p3)  ;;  %159 = vst [vmem:[%s134_s26 + $0x24] sm:$0xff] (%p71_p3), %v158_v3 }
  0x15   : > { %449 = vst [vmem:[%s134_s26 + $0x8] sm:$0xf] %v448_v4  ;;  %451 = vst [vmem:[%s134_s26 + $0x14] sm:$0xf] %v450_v5  ;;  %v454_v7 = vld [vmem:[%s137_s25 + $0x74] sm:$0xf] }
  0x16   : > { %453 = vst [vmem:[%s134_s26 + $0x20] sm:$0xf] %v452_v6  ;;  %455 = vst [vmem:[%s134_s26 + $0x2c] sm:$0xf] %v454_v7 }
  0x17 PF: > { %p456_p5 = scmp.ge.s32.totalorder %s545_s14, 1  ;;  %p179_p6 = scmp.lt.s32.totalorder %s545_s14, 4 }
  0x19   : > { %p180_p7 = pnand %p456_p5, %p179_p6 }
  0x1a   : > { %s186_s27 = sand.u32 (!%p180_p7), 1, %s537_s12   ;;  %vm265_vm0 = vcmask (!%p180_p7), 1043456   ;;  %v547_v8 = vmov (!%p180_p7), 0.0   ;;  %v226_v9 = vld [vmem:[%s630_s1] sm:$0xff] (!%p180_p7)  ;;  %vm548_vm1 = vmmov (!%p180_p7), 0   ;;  %v549_v10 = vmov (!%p180_p7), 0  }
  0x1b   : > { %183 = sbr.rel (%p180_p7) target bundleno = 260 (0x104), region = 54  ;;  %476 = vmatprep.subr.bf16.mxu1 (!%p180_p7), %v547_v8  ;;  %480 = vmatprep.mubr.msk.bf16.mxu1 (!%p180_p7), %vm548_vm1, %v547_v8  ;;  %vm266_vm2 = vcmask (!%p180_p7), 1044480   ;;  %v550_v11 = vmov (!%p180_p7), 65535   ;;  %v217_v23 = vld [vmem:[%s629_s0] sm:$0xf] (!%p180_p7)  ;;  %vm261_vm3 = vcmask (!%p180_p7), 203776  }
  0x1c   : > { %s485_s28 = smul.u32 (!%p180_p7), 48, %s186_s27  ;;  %310 = vmatprep.mubr.bf16.mxu0 (!%p180_p7), %v549_v10  ;;  %v267_v12 = vsel (!%p180_p7), %vm265_vm0, 4294967295, %v550_v11  ;;  %514 = vset.pattern.permute.xlu0 (!%p180_p7), %v549_v10 }
  0x1d   : > { %229 = vperm.xlu0 (!%p180_p7), %514, %v226_v9   ;;  %v268_v16 = vsel (!%p180_p7), %vm266_vm2, %v267_v12, 0  ;;  %s210_s7 = smul.u32 (!%p180_p7), 3, %s443_s15 }
  0x1e   : > { %s188_s4 = scalar_lea.vmem (!%p180_p7), [#allocation2], %s485_s28 }
  0x1f   : > { %v515_v13 = vld [vmem:[%s188_s4 + $0x4] ss:$12 sps:$4 sm:$0xff] (!%p180_p7)   ;;  %v517_v14 = vld [vmem:[%s188_s4 + $0x8] ss:$12 sps:$4 sm:$0xff] (!%p180_p7)   ;;  %v518_v15 = vld [vmem:[%s188_s4] ss:$12 sps:$4 sm:$0xff] (!%p180_p7)  }
  0x20   : > { %278 = vmatprep.subr.bf16.mxu0 (!%p180_p7), %v515_v13  ;;  %477 = vmatpush3.bf16.msra.mxu1 (!%p180_p7), %v517_v14  ;;  %v519_v17 = vld [vmem:[%s188_s4 + $0x1c] ss:$12 sps:$4 sm:$0x1f] (!%p180_p7)   ;;  %v521_v18 = vld [vmem:[%s188_s4 + $0x20] ss:$12 sps:$4 sm:$0x1f] (!%p180_p7)  }
  0x21   : > { %279 = vmatpush1.bf16.msra.mxu0 (!%p180_p7), %v518_v15  ;;  %478 = vmatprep.subr.bf16.mxu1 (!%p180_p7), %v547_v8  ;;  %v273_v19 = vand.u32 (!%p180_p7), %v519_v17, %v268_v16  ;;  %v522_v20 = vld [vmem:[%s188_s4 + $0x18] ss:$12 sps:$4 sm:$0x1f] (!%p180_p7)   ;;  %v276_v21 = vand.u32 (!%p180_p7), %v521_v18, %v268_v16  ;;  %p211_p8 = scmp.lt.s32.totalorder (!%p180_p7), %s210_s7, 8 }
  0x22   : > { %v270_v22 = vand.u32 %v522_v20, %v268_v16 }
  0x23   : > { %280 = vmatprep.subr.bf16.mxu0 %v273_v19  ;;  %s637_s7 = smov (!%p211_p8, %s210_s7), 8 }
  0x24   : > { %479 = vmatpush3.bf16.msra.mxu1 %v276_v21  ;;  %s457_s8 = sshll.u32 %s637_s7, 2 }
  0x25   : > { %281 = vmatpush1.bf16.msra.mxu0 %v270_v22  ;;  %s214_s11 = scalar_lea.vmem %s632_s3, %s457_s8 }
  0x27   : > { %481 = vmatmul.mubr.msk.bf16.vlgmr.msra.gmra.mrb[0].mxu1 %vm261_vm3, %v217_v23 }
  0x28   : > { %464 = vmatmul.mubr.msk.bf16.vlgmr.msra.gmra.mrb[0].mxu0 %vm261_vm3, %v217_v23 }
  0x9c   : > { %v230_v24 = vpop.permute.xlu0 %229 }
  0xfa   : > { %v353_v25 = vpop.f32.mrb[0].mxu1 }
  0xfb   : > { %v354_v26 = vadd.f32 %v353_v25, %v230_v24  ;;  %v312_v27 = vpop.f32.mrb[0].mxu0  ;;  %v482_v28 = vpop.f32.mrb[1].mxu1 }
  0xfc   : > { %v313_v29 = vadd.f32 %v312_v27, %v230_v24  ;;  %v314_v30 = vpop.f32.mrb[1].mxu0  ;;  %v356_v31 = vpop.f32.mrb[2].mxu1 }
  0xfd   : > { %v361_v32 = vmax.f32 %v354_v26, 0.0  ;;  %v315_v33 = vadd.f32 %v314_v30, %v230_v24  ;;  %v316_v34 = vpop.f32.mrb[2].mxu0  ;;  %v483_v35 = vpop.f32.mrb[3].mxu1 }
  0xfe   : > { %v359_v36 = vmax.f32 %v313_v29, 0.0  ;;  %v317_v37 = vpop.f32.mrb[3].mxu0 }
  0xff   : > { %v472_v38 = vpack.c.bf16 %v361_v32, %v361_v32  ;;  %v360_v39 = vmax.f32 %v315_v33, 0.0 }
 0x101   : > { %376 = vst [vmem:[%s214_s11 + $0x8] sm:$0xf] %v472_v38  ;;  %v471_v40 = vpack.c.bf16 %v360_v39, %v359_v36 }
 0x103   : > { %375 = vst [vmem:[%s214_s11] sm:$0xff] %v471_v40 }
 0x104 PF: > { %p10_p9 = scmp.ge.s32.totalorder %s588_s16, 5   ;;  %s633_s12 = smov %s541_s13 }
 0x105   : > { %s634_s13 = smov %s597_s19  ;;  %s635_s14 = smov %s588_s16 }
 0x106   :  { %12 = sbr.rel (!%p10_p9) target bundleno = 2 (0x2), region = 99 }

// kernel: convnet_forward.6
= control target key start
LH: loop header
LB: loop body
LE: loop exit
PB: predicated region body
PF: predicated region fallthrough
CT: control target
= control target key end

     0   :  { %v412_v0 = vmov 0.0   ;;  %vm413_vm0 = vmmov 0   ;;  %v414_v3 = vmov 0   ;;  %s528_s2 = inlined_call_operand.vmem [shape: bf16[128,384], index: 2, kind: input, shape index: {}]   ;;  %s529_s1 = inlined_call_operand.vmem [shape: f32[16,1], index: 1, kind: input, shape index: {}]   ;;  %s530_s0 = inlined_call_operand.vmem [shape: bf16[16,128], index: 0, kind: input, shape index: {}]   ;;  %s531_s3 = inlined_call_operand.vmem [shape: bf16[16,384], index: 3, kind: output, shape index: {}]  }
   0x1   :  { %355 = vmatprep.subr.bf16.mxu1 %v412_v0  ;;  %v379_v1 = vld [vmem:[%s528_s2 + $0x4] ss:$12 sps:$4 sm:$0xff]   ;;  %371 = vmatprep.mubr.msk.bf16.mxu1 %vm413_vm0, %v412_v0  ;;  %v381_v2 = vld [vmem:[%s528_s2 + $0x8] ss:$12 sps:$4 sm:$0xff]   ;;  %v382_v4 = vld [vmem:[%s528_s2] ss:$12 sps:$4 sm:$0xff]  }
   0x2   :  { %227 = vmatprep.mubr.bf16.mxu0 %v414_v3  ;;  %378 = vset.pattern.permute.xlu0 %v414_v3  ;;  %v383_v5 = vld [vmem:[%s528_s2 + $0x1c] ss:$12 sps:$4 sm:$0xff]   ;;  %v385_v6 = vld [vmem:[%s528_s2 + $0x20] ss:$12 sps:$4 sm:$0xff]   ;;  %v386_v7 = vld [vmem:[%s528_s2 + $0x18] ss:$12 sps:$4 sm:$0xff]  }
   0x3   :  { %195 = vmatprep.subr.bf16.mxu0 %v379_v1  ;;  %356 = vmatpush3.bf16.msra.mxu1 %v381_v2  ;;  %v387_v8 = vld [vmem:[%s528_s2 + $0x34] ss:$12 sps:$4 sm:$0xff]   ;;  %v389_v9 = vld [vmem:[%s528_s2 + $0x38] ss:$12 sps:$4 sm:$0xff]   ;;  %v390_v10 = vld [vmem:[%s528_s2 + $0x30] ss:$12 sps:$4 sm:$0xff]  }
   0x4   :  { %196 = vmatpush1.bf16.msra.mxu0 %v382_v4  ;;  %357 = vmatprep.subr.bf16.mxu1 %v412_v0  ;;  %v391_v11 = vld [vmem:[%s528_s2 + $0x4c] ss:$12 sps:$4 sm:$0xff]   ;;  %v393_v12 = vld [vmem:[%s528_s2 + $0x50] ss:$12 sps:$4 sm:$0xff]   ;;  %v394_v13 = vld [vmem:[%s528_s2 + $0x48] ss:$12 sps:$4 sm:$0xff]  }
   0x5   :  { %197 = vmatprep.subr.bf16.mxu0 %v383_v5  ;;  %v395_v14 = vld [vmem:[%s528_s2 + $0x64] ss:$12 sps:$4 sm:$0xff]   ;;  %v397_v15 = vld [vmem:[%s528_s2 + $0x68] ss:$12 sps:$4 sm:$0xff]   ;;  %v398_v16 = vld [vmem:[%s528_s2 + $0x60] ss:$12 sps:$4 sm:$0xff]  }
   0x6   :  { %v399_v17 = vld [vmem:[%s528_s2 + $0x7c] ss:$12 sps:$4 sm:$0xff]   ;;  %v401_v18 = vld [vmem:[%s528_s2 + $0x80] ss:$12 sps:$4 sm:$0xff]   ;;  %v402_v20 = vld [vmem:[%s528_s2 + $0x78] ss:$12 sps:$4 sm:$0xff]  }
   0x7   :  { %358 = vmatpush3.bf16.msra.mxu1 %v385_v6  ;;  %v49_v19 = vld [vmem:[%s529_s1] sm:$0xff]  ;;  %v50_v22 = vld [vmem:[%s529_s1 + $0x8] sm:$0xff]  ;;  %v406_v24 = vld [vmem:[%s528_s2 + $0x90] ss:$12 sps:$4 sm:$0xff]  }
   0x8   :  { %198 = vmatpush1.bf16.msra.mxu0 %v386_v7  ;;  %359 = vmatprep.subr.bf16.mxu1 %v412_v0  ;;  %v403_v21 = vld [vmem:[%s528_s2 + $0x94] ss:$12 sps:$4 sm:$0xff]   ;;  %v405_v23 = vld [vmem:[%s528_s2 + $0x98] ss:$12 sps:$4 sm:$0xff]   ;;  %v409_v26 = vld [vmem:[%s528_s2 + $0xb0] ss:$12 sps:$4 sm:$0xff]  }
   0x9   :  { %199 = vmatprep.subr.bf16.mxu0 %v387_v8  ;;  %53 = vperm.xlu0 %378, %v49_v19   ;;  %v407_v25 = vld [vmem:[%s528_s2 + $0xac] ss:$12 sps:$4 sm:$0xff]   ;;  %v410_v27 = vld [vmem:[%s528_s2 + $0xa8] ss:$12 sps:$4 sm:$0xff]   ;;  %v411_v28 = vld [vmem:[%s530_s0] sm:$0xff]  }
   0xb   :  { %360 = vmatpush3.bf16.msra.mxu1 %v389_v9 }
   0xc   :  { %200 = vmatpush1.bf16.msra.mxu0 %v390_v10  ;;  %361 = vmatprep.subr.bf16.mxu1 %v412_v0 }
   0xd   :  { %201 = vmatprep.subr.bf16.mxu0 %v391_v11  ;;  %58 = vperm.xlu0 %378, %v50_v22  }
   0xf   :  { %362 = vmatpush3.bf16.msra.mxu1 %v393_v12 }
  0x10   :  { %202 = vmatpush1.bf16.msra.mxu0 %v394_v13  ;;  %363 = vmatprep.subr.bf16.mxu1 %v412_v0 }
  0x11   :  { %203 = vmatprep.subr.bf16.mxu0 %v395_v14 }
  0x13   :  { %364 = vmatpush3.bf16.msra.mxu1 %v397_v15 }
  0x14   :  { %204 = vmatpush1.bf16.msra.mxu0 %v398_v16  ;;  %365 = vmatprep.subr.bf16.mxu1 %v412_v0 }
  0x15   :  { %205 = vmatprep.subr.bf16.mxu0 %v399_v17 }
  0x17   :  { %366 = vmatpush3.bf16.msra.mxu1 %v401_v18 }
  0x18   :  { %206 = vmatpush1.bf16.msra.mxu0 %v402_v20  ;;  %367 = vmatprep.subr.bf16.mxu1 %v412_v0 }
  0x19   :  { %207 = vmatprep.subr.bf16.mxu0 %v403_v21 }
  0x1b   :  { %368 = vmatpush3.bf16.msra.mxu1 %v405_v23 }
  0x1c   :  { %208 = vmatpush1.bf16.msra.mxu0 %v406_v24  ;;  %369 = vmatprep.subr.bf16.mxu1 %v412_v0 }
  0x1d   :  { %209 = vmatprep.subr.bf16.mxu0 %v407_v25 }
  0x1f   :  { %370 = vmatpush3.bf16.msra.mxu1 %v409_v26 }
  0x20   :  { %210 = vmatpush1.bf16.msra.mxu0 %v410_v27 }
  0x22   :  { %372 = vmatmul.mubr.bf16.vlgmr.msra.gmra.mrb[0].mxu1 %v411_v28 }
  0x23   :  { %228 = vmatmul.mubr.bf16.vlgmr.msra.gmra.mrb[0].mxu0 %v411_v28 }
  0x88   :  { %v54_v29 = vpop.permute.xlu0 %53 }
  0x8c   :  { %v59_v30 = vpop.permute.xlu0 %58 }
  0xf5   :  { %v272_v31 = vpop.f32.mrb[0].mxu1 }
  0xf6   :  { %v273_v32 = vadd.f32 %v272_v31, %v54_v29  ;;  %v229_v33 = vpop.f32.mrb[0].mxu0  ;;  %v373_v34 = vpop.f32.mrb[1].mxu1 }
  0xf7   :  { %v230_v35 = vadd.f32 %v229_v33, %v54_v29  ;;  %v231_v36 = vpop.f32.mrb[1].mxu0  ;;  %v275_v37 = vpop.f32.mrb[2].mxu1 }
  0xf8   :  { %v281_v38 = vmax.f32 %v273_v32, 0.0  ;;  %v232_v39 = vadd.f32 %v231_v36, %v54_v29  ;;  %v276_v40 = vadd.f32 %v275_v37, %v59_v30  ;;  %v233_v41 = vpop.f32.mrb[2].mxu0  ;;  %v374_v42 = vpop.f32.mrb[3].mxu1 }
  0xf9   :  { %v279_v43 = vmax.f32 %v230_v35, 0.0  ;;  %v234_v44 = vadd.f32 %v233_v41, %v59_v30  ;;  %v235_v45 = vpop.f32.mrb[3].mxu0 }
  0xfa   :  { %v343_v46 = vpack.c.bf16 %v281_v38, %v281_v38  ;;  %v280_v47 = vmax.f32 %v232_v39, 0.0  ;;  %v284_v48 = vmax.f32 %v276_v40, 0.0  ;;  %v236_v49 = vadd.f32 %v235_v45, %v59_v30 }
  0xfb   :  { %v282_v50 = vmax.f32 %v234_v44, 0.0 }
  0xfc   :  { %306 = vst [vmem:[%s531_s3 + $0x8] sm:$0xf] %v343_v46  ;;  %v342_v51 = vpack.c.bf16 %v280_v47, %v279_v43  ;;  %v345_v52 = vpack.c.bf16 %v284_v48, %v284_v48  ;;  %v283_v53 = vmax.f32 %v236_v49, 0.0 }
  0xfe   :  { %305 = vst [vmem:[%s531_s3] sm:$0xff] %v342_v51  ;;  %308 = vst [vmem:[%s531_s3 + $0x14] sm:$0xf] %v345_v52  ;;  %v344_v54 = vpack.c.bf16 %v283_v53, %v282_v50 }
 0x100   :  { %307 = vst [vmem:[%s531_s3 + $0xc] sm:$0xff] %v344_v54 }

// kernel: convnet_forward.7
= control target key start
LH: loop header
LB: loop body
LE: loop exit
PB: predicated region body
PF: predicated region fallthrough
CT: control target
= control target key end

     0   :  { %v540_v0 = vmov 0   ;;  %vm285_vm0 = vcmask 130048   ;;  %s691_s2 = inlined_call_operand.vmem [shape: bf16[400,128], index: 2, kind: input, shape index: {}]   ;;  %s692_s0 = inlined_call_operand.vmem [shape: bf16[32,400], index: 0, kind: input, shape index: {}]   ;;  %s693_s1 = inlined_call_operand.vmem [shape: f32[32,1], index: 1, kind: input, shape index: {}]   ;;  %s694_s3 = inlined_call_operand.vmem [shape: bf16[32,128], index: 3, kind: output, shape index: {}]  }
   0x1   :  { %341 = vmatprep.subr.bf16.mxu1 %v540_v0  ;;  %v503_v1 = vld [vmem:[%s691_s2 + $0x40] sm:$0xff]   ;;  %501 = vset.pattern.permute.xlu0 %v540_v0  ;;  %v506_v4 = vld [vmem:[%s691_s2 + $0x48] sm:$0xff]   ;;  %v509_v7 = vld [vmem:[%s691_s2 + $0x50] sm:$0xff]  }
   0x2   :  { %v504_v2 = vld [vmem:[%s691_s2 + $0x80] sm:$0xff]   ;;  %502 = vset.pattern.permute.xlu1 %v540_v0  ;;  %472 = vmatprep.subr.bf16.mxu0 %v503_v1  ;;  %v507_v5 = vld [vmem:[%s691_s2 + $0x88] sm:$0xff]   ;;  %v510_v8 = vld [vmem:[%s691_s2 + $0x90] sm:$0xff]  }
   0x3   :  { %v505_v3 = vld [vmem:[%s691_s2] sm:$0xff]   ;;  %342 = vmatpush1.bf16.msra.mxu1 %v504_v2  ;;  %v508_v6 = vld [vmem:[%s691_s2 + $0x8] sm:$0xff]   ;;  %v511_v9 = vld [vmem:[%s691_s2 + $0x10] sm:$0xff]  }
   0x4   :  { %473 = vmatpush3.bf16.msra.mxu0 %v505_v3  ;;  %343 = vmatprep.subr.bf16.mxu1 %v540_v0  ;;  %v512_v10 = vld [vmem:[%s691_s2 + $0x58] sm:$0xff]   ;;  %v515_v13 = vld [vmem:[%s691_s2 + $0x60] sm:$0xff]   ;;  %v518_v16 = vld [vmem:[%s691_s2 + $0x68] sm:$0xff]  }
   0x5   :  { %474 = vmatprep.subr.bf16.mxu0 %v506_v4  ;;  %v513_v11 = vld [vmem:[%s691_s2 + $0x98] sm:$0xff]   ;;  %v516_v14 = vld [vmem:[%s691_s2 + $0xa0] sm:$0xff]   ;;  %v519_v17 = vld [vmem:[%s691_s2 + $0xa8] sm:$0xff]  }
   0x6   :  { %v514_v12 = vld [vmem:[%s691_s2 + $0x18] sm:$0xff]   ;;  %v517_v15 = vld [vmem:[%s691_s2 + $0x20] sm:$0xff]   ;;  %v520_v18 = vld [vmem:[%s691_s2 + $0x28] sm:$0xff]  }
   0x7   :  { %344 = vmatpush1.bf16.msra.mxu1 %v507_v5  ;;  %v521_v19 = vld [vmem:[%s691_s2 + $0x70] sm:$0xff]   ;;  %v524_v22 = vld [vmem:[%s691_s2 + $0x78] sm:$0xff]   ;;  %v73_v27 = vld [vmem:[%s693_s1] sm:$0xff] }
   0x8   :  { %475 = vmatpush3.bf16.msra.mxu0 %v508_v6  ;;  %345 = vmatprep.subr.bf16.mxu1 %v540_v0  ;;  %v522_v20 = vld [vmem:[%s691_s2 + $0xb0] sm:$0xff]   ;;  %v525_v24 = vld [vmem:[%s691_s2 + $0xb8] sm:$0xff]   ;;  %v530_v30 = vld [vmem:[%s691_s2 + $0xc0] sm:$0xff]  }
   0x9   :  { %476 = vmatprep.subr.bf16.mxu0 %v509_v7  ;;  %v523_v21 = vld [vmem:[%s691_s2 + $0x30] sm:$0xff]   ;;  %v533_v25 = vld [vmem:[%s692_s0 + $0xc] ss:$16 sps:$4 sm:$0xff]   ;;  %79 = vperm.xlu0 %501, %v73_v27   ;;  %v531_v33 = vld [vmem:[%s692_s0 + $0x8] ss:$16 sps:$4 sm:$0xff]  }
   0xa   :  { %v529_v23 = vld [vmem:[%s692_s0 + $0x4] ss:$16 sps:$4 sm:$0xff]   ;;  %v526_v26 = vld [vmem:[%s691_s2 + $0x38] sm:$0xff]   ;;  %451 = vmatprep.mubr.msk.bf16.mxu1 %vm285_vm0, %v533_v25  ;;  %v527_v29 = vld [vmem:[%s692_s0] ss:$16 sps:$4 sm:$0xff]  }
   0xb   :  { %346 = vmatpush1.bf16.msra.mxu1 %v510_v8  ;;  %324 = vmatprep.mubr.bf16.mxu0 %v529_v23  ;;  %v75_v28 = vld [vmem:[%s693_s1 + $0x10] sm:$0xff]  ;;  %v74_v32 = vld [vmem:[%s693_s1 + $0x8] sm:$0xff]  ;;  %v76_v34 = vld [vmem:[%s693_s1 + $0x18] sm:$0xff] }
   0xc   :  { %477 = vmatpush3.bf16.msra.mxu0 %v511_v9  ;;  %347 = vmatprep.subr.bf16.mxu1 %v540_v0  ;;  %v534_v31 = vld [vmem:[%s692_s0 + $0x24] ss:$16 sps:$4 sm:$0xff]   ;;  %v537_v35 = vld [vmem:[%s692_s0 + $0x2c] ss:$16 sps:$4 sm:$0xff]   ;;  %v536_v36 = vld [vmem:[%s692_s0 + $0x20] ss:$16 sps:$4 sm:$0xff]  }
   0xd   :  { %478 = vmatprep.subr.bf16.mxu0 %v512_v10  ;;  %89 = vperm.xlu1 %502, %v75_v28   ;;  %v539_v37 = vld [vmem:[%s692_s0 + $0x28] ss:$16 sps:$4 sm:$0xff]  }
   0xe   :  { %84 = vperm.xlu0 %501, %v74_v32  }
   0xf   :  { %348 = vmatpush1.bf16.msra.mxu1 %v513_v11 }
  0x10   :  { %479 = vmatpush3.bf16.msra.mxu0 %v514_v12  ;;  %349 = vmatprep.subr.bf16.mxu1 %v540_v0 }
  0x11   :  { %480 = vmatprep.subr.bf16.mxu0 %v515_v13  ;;  %94 = vperm.xlu1 %502, %v76_v34  }
  0x13   :  { %350 = vmatpush1.bf16.msra.mxu1 %v516_v14 }
  0x14   :  { %481 = vmatpush3.bf16.msra.mxu0 %v517_v15  ;;  %351 = vmatprep.subr.bf16.mxu1 %v540_v0 }
  0x15   :  { %482 = vmatprep.subr.bf16.mxu0 %v518_v16 }
  0x17   :  { %352 = vmatpush1.bf16.msra.mxu1 %v519_v17 }
  0x18   :  { %483 = vmatpush3.bf16.msra.mxu0 %v520_v18  ;;  %353 = vmatprep.subr.bf16.mxu1 %v540_v0 }
  0x19   :  { %484 = vmatprep.subr.bf16.mxu0 %v521_v19 }
  0x1b   :  { %354 = vmatpush1.bf16.msra.mxu1 %v522_v20 }
  0x1c   :  { %485 = vmatpush3.bf16.msra.mxu0 %v523_v21  ;;  %355 = vmatprep.subr.bf16.mxu1 %v540_v0 }
  0x1d   :  { %486 = vmatprep.subr.bf16.mxu0 %v524_v22 }
  0x1f   :  { %356 = vmatpush1.bf16.msra.mxu1 %v525_v24 }
  0x20   :  { %487 = vmatpush3.bf16.msra.mxu0 %v526_v26  ;;  %357 = vmatprep.subr.bf16.mxu1 %v540_v0 }
  0x23   :  { %325 = vmatmul.mubr.bf16.vlgmr.msra.gmra.mrb[0].mxu0 %v527_v29  ;;  %358 = vmatpush1.bf16.msra.mxu1 %v530_v30 }
  0x24   :  { %332 = vmatprep.mubr.bf16.mxu0 %v534_v31 }
  0x26   :  { %374 = vmatmul.mubr.bf16.vlgmr.msra.gmra.mrb[0].mxu1 %v531_v33 }
  0x27   :  { %452 = vmatprep.mubr.msk.bf16.mxu1 %vm285_vm0, %v537_v35 }
  0x2b   :  { %333 = vmatmul.mubr.bf16.gmra.mrb[4].mxu0 %v536_v36 }
  0x2e   :  { %382 = vmatmul.mubr.bf16.gmra.mrb[4].mxu1 %v539_v37 }
  0x88   :  { %v80_v38 = vpop.permute.xlu0 %79 }
  0x8c   :  { %v90_v53 = vpop.permute.xlu1 %89 }
  0x8d   :  { %v85_v43 = vpop.permute.xlu0 %84 }
  0x90   :  { %v95_v3 = vpop.permute.xlu1 %94 }
  0xf6   :  { %v488_v39 = vpop.f32.mrb[0].mxu0 }
  0xf7   :  { %v489_v40 = vpop.f32.mrb[1].mxu0 }
  0xf8   :  { %v490_v41 = vadd.f32 %v489_v40, %v488_v39  ;;  %v491_v42 = vpop.f32.mrb[2].mxu0 }
  0xf9   :  { %v492_v44 = vpop.f32.mrb[3].mxu0  ;;  %v375_v45 = vpop.f32.mrb[0].mxu1 }
  0xfa   :  { %v493_v46 = vadd.f32 %v492_v44, %v491_v42  ;;  %v327_v47 = vadd.f32 %v490_v41, %v80_v38  ;;  %v377_v48 = vpop.f32.mrb[1].mxu1 }
  0xfb   :  { %v378_v49 = vpop.f32.mrb[2].mxu1 }
  0xfc   :  { %v376_v50 = vadd.f32 %v375_v45, %v327_v47  ;;  %v330_v51 = vadd.f32 %v493_v46, %v85_v43  ;;  %v380_v52 = vpop.f32.mrb[3].mxu1 }
  0xfe   :  { %v379_v54 = vadd.f32 %v378_v49, %v330_v51  ;;  %v494_v55 = vpop.f32.mrb[4].mxu0  ;;  %v390_v57 = vmax.f32 %v376_v50, 0.0 }
  0xff   :  { %v495_v56 = vpop.f32.mrb[5].mxu0 }
 0x100   :  { %v391_v58 = vmax.f32 %v379_v54, 0.0  ;;  %v496_v59 = vadd.f32 %v495_v56, %v494_v55  ;;  %v497_v60 = vpop.f32.mrb[6].mxu0 }
 0x101   :  { %v498_v61 = vpop.f32.mrb[7].mxu0  ;;  %v383_v62 = vpop.f32.mrb[4].mxu1 }
 0x102   :  { %v464_v63 = vpack.c.bf16 %v391_v58, %v390_v57  ;;  %v499_v0 = vadd.f32 %v498_v61, %v497_v60  ;;  %v335_v1 = vadd.f32 %v496_v59, %v90_v53  ;;  %v385_v2 = vpop.f32.mrb[5].mxu1 }
 0x103   :  { %v386_v4 = vpop.f32.mrb[6].mxu1 }
 0x104   :  { %465 = vst [vmem:[%s694_s3] sm:$0xff] %v464_v63   ;;  %v384_v5 = vadd.f32 %v383_v62, %v335_v1  ;;  %v338_v6 = vadd.f32 %v499_v0, %v95_v3  ;;  %v388_v7 = vpop.f32.mrb[7].mxu1 }
 0x106   :  { %v387_v8 = vadd.f32 %v386_v4, %v338_v6  ;;  %v392_v9 = vmax.f32 %v384_v5, 0.0 }
 0x108   :  { %v393_v10 = vmax.f32 %v387_v8, 0.0 }
 0x10a   :  { %v469_v11 = vpack.c.bf16 %v393_v10, %v392_v9 }
 0x10c   :  { %471 = vst [vmem:[%s694_s3 + $0x8] sm:$0xff] %v469_v11  }

// kernel: convnet_forward.8
= control target key start
LH: loop header
LB: loop body
LE: loop exit
PB: predicated region body
PF: predicated region fallthrough
CT: control target
= control target key end

     0   :  { %v823_v1 = vmov 0   ;;  %s1024_s2 = inlined_call_operand.vmem [shape: bf16[512,128], index: 2, kind: input, shape index: {}]   ;;  %s1025_s0 = inlined_call_operand.vmem [shape: bf16[64,512], index: 0, kind: input, shape index: {}]   ;;  %s1026_s1 = inlined_call_operand.vmem [shape: f32[64,1], index: 1, kind: input, shape index: {}]   ;;  %s1027_s3 = inlined_call_operand.vmem [shape: bf16[64,128], index: 3, kind: output, shape index: {}]  }
   0x1   :  { %v767_v0 = vld [vmem:[%s1024_s2 + $0x40] sm:$0xff]   ;;  %765 = vset.pattern.permute.xlu0 %v823_v1  ;;  %766 = vset.pattern.permute.xlu1 %v823_v1  ;;  %v771_v5 = vld [vmem:[%s1024_s2 + $0x48] sm:$0xff]   ;;  %v775_v9 = vld [vmem:[%s1024_s2 + $0x50] sm:$0xff]  }
   0x2   :  { %v768_v2 = vld [vmem:[%s1024_s2 + $0xc0] sm:$0xff]   ;;  %684 = vmatprep.subr.bf16.mxu0 %v767_v0  ;;  %v772_v6 = vld [vmem:[%s1024_s2 + $0xc8] sm:$0xff]   ;;  %v776_v10 = vld [vmem:[%s1024_s2 + $0xd0] sm:$0xff]  }
   0x3   :  { %v769_v3 = vld [vmem:[%s1024_s2] sm:$0xff]   ;;  %724 = vmatprep.subr.bf16.mxu1 %v768_v2  ;;  %v773_v7 = vld [vmem:[%s1024_s2 + $0x8] sm:$0xff]   ;;  %v777_v11 = vld [vmem:[%s1024_s2 + $0x10] sm:$0xff]  }
   0x4   :  { %v770_v4 = vld [vmem:[%s1024_s2 + $0x80] sm:$0xff]   ;;  %685 = vmatpush3.bf16.msra.mxu0 %v769_v3  ;;  %v774_v8 = vld [vmem:[%s1024_s2 + $0x88] sm:$0xff]   ;;  %v778_v12 = vld [vmem:[%s1024_s2 + $0x90] sm:$0xff]  }
   0x5   :  { %725 = vmatpush3.bf16.msra.mxu1 %v770_v4  ;;  %686 = vmatprep.subr.bf16.mxu0 %v771_v5  ;;  %v779_v13 = vld [vmem:[%s1024_s2 + $0x58] sm:$0xff]   ;;  %v783_v17 = vld [vmem:[%s1024_s2 + $0x60] sm:$0xff]   ;;  %v787_v21 = vld [vmem:[%s1024_s2 + $0x68] sm:$0xff]  }
   0x6   :  { %726 = vmatprep.subr.bf16.mxu1 %v772_v6  ;;  %v780_v14 = vld [vmem:[%s1024_s2 + $0xd8] sm:$0xff]   ;;  %v784_v18 = vld [vmem:[%s1024_s2 + $0xe0] sm:$0xff]   ;;  %v788_v22 = vld [vmem:[%s1024_s2 + $0xe8] sm:$0xff]  }
   0x7   :  { %v781_v15 = vld [vmem:[%s1024_s2 + $0x18] sm:$0xff]   ;;  %v785_v19 = vld [vmem:[%s1024_s2 + $0x20] sm:$0xff]   ;;  %v789_v23 = vld [vmem:[%s1024_s2 + $0x28] sm:$0xff]  }
   0x8   :  { %687 = vmatpush3.bf16.msra.mxu0 %v773_v7  ;;  %v782_v16 = vld [vmem:[%s1024_s2 + $0x98] sm:$0xff]   ;;  %v786_v20 = vld [vmem:[%s1024_s2 + $0xa0] sm:$0xff]   ;;  %v790_v24 = vld [vmem:[%s1024_s2 + $0xa8] sm:$0xff]  }
   0x9   :  { %727 = vmatpush3.bf16.msra.mxu1 %v774_v8  ;;  %688 = vmatprep.subr.bf16.mxu0 %v775_v9  ;;  %v791_v25 = vld [vmem:[%s1024_s2 + $0x70] sm:$0xff]   ;;  %v795_v29 = vld [vmem:[%s1024_s2 + $0x78] sm:$0xff]   ;;  %v95_v43 = vld [vmem:[%s1026_s1] sm:$0xff] }
   0xa   :  { %728 = vmatprep.subr.bf16.mxu1 %v776_v10  ;;  %v792_v26 = vld [vmem:[%s1024_s2 + $0xf0] sm:$0xff]   ;;  %v796_v30 = vld [vmem:[%s1024_s2 + $0xf8] sm:$0xff]   ;;  %105 = vperm.xlu0 %765, %v95_v43   ;;  %v96_v45 = vld [vmem:[%s1026_s1 + $0x8] sm:$0xff] }
   0xb   :  { %v793_v27 = vld [vmem:[%s1024_s2 + $0x30] sm:$0xff]   ;;  %v797_v31 = vld [vmem:[%s1024_s2 + $0x38] sm:$0xff]   ;;  %v99_v48 = vld [vmem:[%s1026_s1 + $0x20] sm:$0xff] }
   0xc   :  { %689 = vmatpush3.bf16.msra.mxu0 %v777_v11  ;;  %v794_v28 = vld [vmem:[%s1024_s2 + $0xb0] sm:$0xff]   ;;  %v798_v32 = vld [vmem:[%s1024_s2 + $0xb8] sm:$0xff]   ;;  %v100_v51 = vld [vmem:[%s1026_s1 + $0x28] sm:$0xff] }
   0xd   :  { %729 = vmatpush3.bf16.msra.mxu1 %v778_v12  ;;  %690 = vmatprep.subr.bf16.mxu0 %v779_v13  ;;  %v799_v33 = vld [vmem:[%s1025_s0] ss:$16 sps:$4 sm:$0xff]   ;;  %v801_v34 = vld [vmem:[%s1025_s0 + $0x4] ss:$16 sps:$4 sm:$0xff]   ;;  %v802_v35 = vld [vmem:[%s1025_s0 + $0x8] ss:$16 sps:$4 sm:$0xff]  }
   0xe   :  { %730 = vmatprep.subr.bf16.mxu1 %v780_v14  ;;  %v804_v36 = vld [vmem:[%s1025_s0 + $0xc] ss:$16 sps:$4 sm:$0xff]   ;;  %447 = vmatprep.mubr.bf16.mxu0 %v801_v34  ;;  %v805_v37 = vld [vmem:[%s1025_s0 + $0x24] ss:$16 sps:$4 sm:$0xff]   ;;  %v809_v39 = vld [vmem:[%s1025_s0 + $0x20] ss:$16 sps:$4 sm:$0xff]  }
   0xf   :  { %512 = vmatprep.mubr.bf16.mxu1 %v804_v36  ;;  %v807_v38 = vld [vmem:[%s1025_s0 + $0x2c] ss:$16 sps:$4 sm:$0xff]   ;;  %v810_v40 = vld [vmem:[%s1025_s0 + $0x28] ss:$16 sps:$4 sm:$0xff]   ;;  %v811_v41 = vld [vmem:[%s1025_s0 + $0x44] ss:$16 sps:$4 sm:$0xff]   ;;  %110 = vperm.xlu0 %765, %v96_v45  }
  0x10   :  { %691 = vmatpush3.bf16.msra.mxu0 %v781_v15  ;;  %v813_v42 = vld [vmem:[%s1025_s0 + $0x4c] ss:$16 sps:$4 sm:$0xff]   ;;  %v97_v44 = vld [vmem:[%s1026_s1 + $0x10] sm:$0xff]  ;;  %v816_v49 = vld [vmem:[%s1025_s0 + $0x48] ss:$16 sps:$4 sm:$0xff]  }
  0x11   :  { %731 = vmatpush3.bf16.msra.mxu1 %v782_v16  ;;  %692 = vmatprep.subr.bf16.mxu0 %v783_v17  ;;  %v98_v46 = vld [vmem:[%s1026_s1 + $0x18] sm:$0xff]  ;;  %v815_v47 = vld [vmem:[%s1025_s0 + $0x40] ss:$16 sps:$4 sm:$0xff]   ;;  %v817_v50 = vld [vmem:[%s1025_s0 + $0x64] ss:$16 sps:$4 sm:$0xff]  }
  0x12   :  { %732 = vmatprep.subr.bf16.mxu1 %v784_v18  ;;  %115 = vperm.xlu1 %766, %v97_v44   ;;  %v819_v52 = vld [vmem:[%s1025_s0 + $0x6c] ss:$16 sps:$4 sm:$0xff]   ;;  %v101_v53 = vld [vmem:[%s1026_s1 + $0x30] sm:$0xff]  ;;  %v822_v56 = vld [vmem:[%s1025_s0 + $0x68] ss:$16 sps:$4 sm:$0xff]  }
  0x13   :  { %125 = vperm.xlu0 %765, %v99_v48   ;;  %v102_v54 = vld [vmem:[%s1026_s1 + $0x38] sm:$0xff]  ;;  %v821_v55 = vld [vmem:[%s1025_s0 + $0x60] ss:$16 sps:$4 sm:$0xff]  }
  0x14   :  { %693 = vmatpush3.bf16.msra.mxu0 %v785_v19 }
  0x15   :  { %733 = vmatpush3.bf16.msra.mxu1 %v786_v20  ;;  %694 = vmatprep.subr.bf16.mxu0 %v787_v21 }
  0x16   :  { %734 = vmatprep.subr.bf16.mxu1 %v788_v22  ;;  %120 = vperm.xlu1 %766, %v98_v46  }
  0x17   :  { %135 = vperm.xlu0 %765, %v101_v53  }
  0x18   :  { %695 = vmatpush3.bf16.msra.mxu0 %v789_v23 }
  0x19   :  { %735 = vmatpush3.bf16.msra.mxu1 %v790_v24  ;;  %696 = vmatprep.subr.bf16.mxu0 %v791_v25 }
  0x1a   :  { %736 = vmatprep.subr.bf16.mxu1 %v792_v26  ;;  %130 = vperm.xlu1 %766, %v100_v51  }
  0x1c   :  { %697 = vmatpush3.bf16.msra.mxu0 %v793_v27 }
  0x1d   :  { %737 = vmatpush3.bf16.msra.mxu1 %v794_v28  ;;  %698 = vmatprep.subr.bf16.mxu0 %v795_v29 }
  0x1e   :  { %738 = vmatprep.subr.bf16.mxu1 %v796_v30  ;;  %140 = vperm.xlu1 %766, %v102_v54  }
  0x20   :  { %699 = vmatpush3.bf16.msra.mxu0 %v797_v31 }
  0x21   :  { %739 = vmatpush3.bf16.msra.mxu1 %v798_v32 }
  0x23   :  { %448 = vmatmul.mubr.bf16.vlgmr.msra.gmra.mrb[0].mxu0 %v799_v33 }
  0x24   :  { %513 = vmatmul.mubr.bf16.vlgmr.msra.gmra.mrb[0].mxu1 %v802_v35  ;;  %455 = vmatprep.mubr.bf16.mxu0 %v805_v37 }
  0x25   :  { %520 = vmatprep.mubr.bf16.mxu1 %v807_v38 }
  0x2b   :  { %456 = vmatmul.mubr.bf16.gmra.mrb[4].mxu0 %v809_v39 }
  0x2c   :  { %521 = vmatmul.mubr.bf16.gmra.mrb[4].mxu1 %v810_v40  ;;  %463 = vmatprep.mubr.bf16.mxu0 %v811_v41 }
  0x2d   :  { %528 = vmatprep.mubr.bf16.mxu1 %v813_v42 }
  0x33   :  { %464 = vmatmul.mubr.bf16.gmra.mrb[8].mxu0 %v815_v47 }
  0x34   :  { %529 = vmatmul.mubr.bf16.gmra.mrb[8].mxu1 %v816_v49  ;;  %471 = vmatprep.mubr.bf16.mxu0 %v817_v50 }
  0x35   :  { %536 = vmatprep.mubr.bf16.mxu1 %v819_v52 }
  0x3b   :  { %472 = vmatmul.mubr.bf16.gmra.mrb[12].mxu0 %v821_v55 }
  0x3c   :  { %537 = vmatmul.mubr.bf16.gmra.mrb[12].mxu1 %v822_v56 }
  0x89   :  { %v106_v57 = vpop.permute.xlu0 %105 }
  0x8e   :  { %v111_v59 = vpop.permute.xlu0 %110 }
  0x91   :  { %v116_v10 = vpop.permute.xlu1 %115 }
  0x92   :  { %v126_v32 = vpop.permute.xlu0 %125 }
  0x95   :  { %v121_v27 = vpop.permute.xlu1 %120 }
  0x96   :  { %v136_v52 = vpop.permute.xlu0 %135 }
  0x99   :  { %v131_v48 = vpop.permute.xlu1 %130 }
  0xf6   :  { %v700_v58 = vpop.f32.mrb[0].mxu0 }
  0xf7   :  { %v740_v60 = vpop.f32.mrb[0].mxu1  ;;  %v701_v61 = vpop.f32.mrb[1].mxu0 }
  0xf8   :  { %v702_v62 = vadd.f32 %v701_v61, %v700_v58  ;;  %v741_v63 = vpop.f32.mrb[1].mxu1  ;;  %v703_v0 = vpop.f32.mrb[2].mxu0 }
  0xf9   :  { %v742_v1 = vadd.f32 %v741_v63, %v740_v60  ;;  %v743_v2 = vpop.f32.mrb[2].mxu1  ;;  %v704_v3 = vpop.f32.mrb[3].mxu0 }
  0xfa   :  { %v450_v4 = vadd.f32 %v702_v62, %v106_v57  ;;  %v705_v5 = vadd.f32 %v704_v3, %v703_v0  ;;  %v744_v6 = vpop.f32.mrb[3].mxu1 }
  0xfb   :  { %v745_v7 = vadd.f32 %v744_v6, %v743_v2 }
  0xfc   :  { %v515_v8 = vadd.f32 %v742_v1, %v450_v4  ;;  %v453_v9 = vadd.f32 %v705_v5, %v111_v59  ;;  %v141_v5 = vpop.permute.xlu1 %140 }
  0xfe   :  { %v518_v11 = vadd.f32 %v745_v7, %v453_v9  ;;  %v706_v12 = vpop.f32.mrb[4].mxu0  ;;  %v545_v15 = vmax.f32 %v515_v8, 0.0 }
  0xff   :  { %v746_v13 = vpop.f32.mrb[4].mxu1  ;;  %v707_v14 = vpop.f32.mrb[5].mxu0 }
 0x100   :  { %v546_v16 = vmax.f32 %v518_v11, 0.0  ;;  %v708_v17 = vadd.f32 %v707_v14, %v706_v12  ;;  %v747_v18 = vpop.f32.mrb[5].mxu1  ;;  %v709_v19 = vpop.f32.mrb[6].mxu0 }
 0x101   :  { %v748_v20 = vadd.f32 %v747_v18, %v746_v13  ;;  %v749_v21 = vpop.f32.mrb[6].mxu1  ;;  %v710_v22 = vpop.f32.mrb[7].mxu0 }
 0x102   :  { %v664_v23 = vpack.c.bf16 %v546_v16, %v545_v15  ;;  %v458_v24 = vadd.f32 %v708_v17, %v116_v10  ;;  %v711_v25 = vadd.f32 %v710_v22, %v709_v19  ;;  %v750_v26 = vpop.f32.mrb[7].mxu1 }
 0x103   :  { %v751_v28 = vadd.f32 %v750_v26, %v749_v21 }
 0x104   :  { %665 = vst [vmem:[%s1027_s3] sm:$0xff] %v664_v23   ;;  %v523_v29 = vadd.f32 %v748_v20, %v458_v24  ;;  %v461_v30 = vadd.f32 %v711_v25, %v121_v27 }
 0x106   :  { %v526_v31 = vadd.f32 %v751_v28, %v461_v30  ;;  %v712_v33 = vpop.f32.mrb[8].mxu0  ;;  %v547_v36 = vmax.f32 %v523_v29, 0.0 }
 0x107   :  { %v752_v34 = vpop.f32.mrb[8].mxu1  ;;  %v713_v35 = vpop.f32.mrb[9].mxu0 }
 0x108   :  { %v548_v37 = vmax.f32 %v526_v31, 0.0  ;;  %v714_v38 = vadd.f32 %v713_v35, %v712_v33  ;;  %v753_v39 = vpop.f32.mrb[9].mxu1  ;;  %v715_v40 = vpop.f32.mrb[10].mxu0 }
 0x109   :  { %v754_v41 = vadd.f32 %v753_v39, %v752_v34  ;;  %v755_v42 = vpop.f32.mrb[10].mxu1  ;;  %v716_v43 = vpop.f32.mrb[11].mxu0 }
 0x10a   :  { %v669_v44 = vpack.c.bf16 %v548_v37, %v547_v36  ;;  %v466_v45 = vadd.f32 %v714_v38, %v126_v32  ;;  %v717_v46 = vadd.f32 %v716_v43, %v715_v40  ;;  %v756_v47 = vpop.f32.mrb[11].mxu1 }
 0x10b   :  { %v757_v49 = vadd.f32 %v756_v47, %v755_v42 }
 0x10c   :  { %681 = vst [vmem:[%s1027_s3 + $0x8] sm:$0xff] %v669_v44   ;;  %v531_v50 = vadd.f32 %v754_v41, %v466_v45  ;;  %v469_v51 = vadd.f32 %v717_v46, %v131_v48 }
 0x10e   :  { %v534_v53 = vadd.f32 %v757_v49, %v469_v51  ;;  %v718_v54 = vpop.f32.mrb[12].mxu0  ;;  %v549_v57 = vmax.f32 %v531_v50, 0.0 }
 0x10f   :  { %v758_v55 = vpop.f32.mrb[12].mxu1  ;;  %v719_v56 = vpop.f32.mrb[13].mxu0 }
 0x110   :  { %v550_v58 = vmax.f32 %v534_v53, 0.0  ;;  %v720_v59 = vadd.f32 %v719_v56, %v718_v54  ;;  %v759_v60 = vpop.f32.mrb[13].mxu1  ;;  %v721_v61 = vpop.f32.mrb[14].mxu0 }
 0x111   :  { %v760_v62 = vadd.f32 %v759_v60, %v758_v55  ;;  %v761_v63 = vpop.f32.mrb[14].mxu1  ;;  %v722_v0 = vpop.f32.mrb[15].mxu0 }
 0x112   :  { %v674_v1 = vpack.c.bf16 %v550_v58, %v549_v57  ;;  %v474_v2 = vadd.f32 %v720_v59, %v136_v52  ;;  %v723_v3 = vadd.f32 %v722_v0, %v721_v61  ;;  %v762_v4 = vpop.f32.mrb[15].mxu1 }
 0x113   :  { %v763_v6 = vadd.f32 %v762_v4, %v761_v63 }
 0x114   :  { %682 = vst [vmem:[%s1027_s3 + $0x10] sm:$0xff] %v674_v1   ;;  %v539_v7 = vadd.f32 %v760_v62, %v474_v2  ;;  %v477_v8 = vadd.f32 %v723_v3, %v141_v5 }
 0x116   :  { %v542_v9 = vadd.f32 %v763_v6, %v477_v8  ;;  %v551_v10 = vmax.f32 %v539_v7, 0.0 }
 0x118   :  { %v552_v11 = vmax.f32 %v542_v9, 0.0 }
 0x11a   :  { %v679_v12 = vpack.c.bf16 %v552_v11, %v551_v10 }
 0x11c   :  { %683 = vst [vmem:[%s1027_s3 + $0x18] sm:$0xff] %v679_v12  }

// kernel: convnet_forward.9
= control target key start
LH: loop header
LB: loop body
LE: loop exit
PB: predicated region body
PF: predicated region fallthrough
CT: control target
= control target key end

     0   :  { %v1016_v1 = vmov 0   ;;  %vm751_vm0 = vcmask 1041408   ;;  %s1267_s2 = inlined_call_operand.vmem [shape: bf16[1024,128], index: 2, kind: input, shape index: {}]   ;;  %s1268_s0 = inlined_call_operand.vmem [shape: bf16[10,1024], index: 0, kind: input, shape index: {}]   ;;  %s1269_s1 = inlined_call_operand.vmem [shape: f32[10,1], index: 1, kind: input, shape index: {}]   ;;  %s1270_s3 = inlined_call_operand.vmem [shape: f32[10,128], index: 3, kind: output, shape index: {}]  }
   0x1   :  { %v946_v0 = vld [vmem:[%s1267_s2 + $0x40] sm:$0xff]   ;;  %945 = vset.pattern.permute.xlu0 %v1016_v1  ;;  %v950_v5 = vld [vmem:[%s1267_s2 + $0x48] sm:$0xff]   ;;  %v954_v9 = vld [vmem:[%s1267_s2 + $0x50] sm:$0xff]  }
   0x2   :  { %v947_v2 = vld [vmem:[%s1267_s2 + $0xc0] sm:$0xff]   ;;  %856 = vmatprep.subr.bf16.mxu0 %v946_v0  ;;  %v951_v6 = vld [vmem:[%s1267_s2 + $0xc8] sm:$0xff]   ;;  %v955_v10 = vld [vmem:[%s1267_s2 + $0xd0] sm:$0xff]  }
   0x3   :  { %v948_v3 = vld [vmem:[%s1267_s2] sm:$0xff]   ;;  %878 = vmatprep.subr.bf16.mxu1 %v947_v2  ;;  %v952_v7 = vld [vmem:[%s1267_s2 + $0x8] sm:$0xff]   ;;  %v956_v11 = vld [vmem:[%s1267_s2 + $0x10] sm:$0xff]  }
   0x4   :  { %v949_v4 = vld [vmem:[%s1267_s2 + $0x80] sm:$0xff]   ;;  %857 = vmatpush3.bf16.msra.mxu0 %v948_v3  ;;  %v953_v8 = vld [vmem:[%s1267_s2 + $0x88] sm:$0xff]   ;;  %v957_v12 = vld [vmem:[%s1267_s2 + $0x90] sm:$0xff]  }
   0x5   :  { %879 = vmatpush3.bf16.msra.mxu1 %v949_v4  ;;  %858 = vmatprep.subr.bf16.mxu0 %v950_v5  ;;  %v958_v13 = vld [vmem:[%s1267_s2 + $0x58] sm:$0xff]   ;;  %v962_v17 = vld [vmem:[%s1267_s2 + $0x60] sm:$0xff]   ;;  %v966_v21 = vld [vmem:[%s1267_s2 + $0x68] sm:$0xff]  }
   0x6   :  { %880 = vmatprep.subr.bf16.mxu1 %v951_v6  ;;  %v959_v14 = vld [vmem:[%s1267_s2 + $0xd8] sm:$0xff]   ;;  %v963_v18 = vld [vmem:[%s1267_s2 + $0xe0] sm:$0xff]   ;;  %v967_v22 = vld [vmem:[%s1267_s2 + $0xe8] sm:$0xff]  }
   0x7   :  { %v960_v15 = vld [vmem:[%s1267_s2 + $0x18] sm:$0xff]   ;;  %v964_v19 = vld [vmem:[%s1267_s2 + $0x20] sm:$0xff]   ;;  %v968_v23 = vld [vmem:[%s1267_s2 + $0x28] sm:$0xff]  }
   0x8   :  { %859 = vmatpush3.bf16.msra.mxu0 %v952_v7  ;;  %v961_v16 = vld [vmem:[%s1267_s2 + $0x98] sm:$0xff]   ;;  %v965_v20 = vld [vmem:[%s1267_s2 + $0xa0] sm:$0xff]   ;;  %v969_v24 = vld [vmem:[%s1267_s2 + $0xa8] sm:$0xff]  }
   0x9   :  { %881 = vmatpush3.bf16.msra.mxu1 %v953_v8  ;;  %860 = vmatprep.subr.bf16.mxu0 %v954_v9  ;;  %v970_v25 = vld [vmem:[%s1267_s2 + $0x70] sm:$0xff]   ;;  %v974_v29 = vld [vmem:[%s1267_s2 + $0x78] sm:$0xff]   ;;  %v15_v33 = vld [vmem:[%s1268_s0] sm:$0xff] }
   0xa   :  { %882 = vmatprep.subr.bf16.mxu1 %v955_v10  ;;  %v971_v26 = vld [vmem:[%s1267_s2 + $0xf0] sm:$0xff]   ;;  %v975_v30 = vld [vmem:[%s1267_s2 + $0xf8] sm:$0xff]   ;;  %v19_v34 = vld [vmem:[%s1268_s0 + $0x20] sm:$0x11] }
   0xb   :  { %v972_v27 = vld [vmem:[%s1267_s2 + $0x30] sm:$0xff]   ;;  %v976_v31 = vld [vmem:[%s1267_s2 + $0x38] sm:$0xff]   ;;  %v16_v35 = vld [vmem:[%s1268_s0 + $0x8] sm:$0xff]  ;;  %v784_v36 = vcombine.low %v15_v33, %v19_v34  ;;  %v785_v37 = vcombine.high %v15_v33, %v19_v34 }
   0xc   :  { %861 = vmatpush3.bf16.msra.mxu0 %v956_v11  ;;  %v973_v28 = vld [vmem:[%s1267_s2 + $0xb0] sm:$0xff]   ;;  %v977_v32 = vld [vmem:[%s1267_s2 + $0xb8] sm:$0xff]   ;;  %v20_v38 = vld [vmem:[%s1268_s0 + $0x28] sm:$0x11] }
   0xd   :  { %883 = vmatpush3.bf16.msra.mxu1 %v957_v12  ;;  %862 = vmatprep.subr.bf16.mxu0 %v958_v13  ;;  %v786_v39 = vcombine.low %v16_v35, %v20_v38  ;;  %v787_v40 = vcombine.high %v16_v35, %v20_v38  ;;  %v978_v41 = vld [vmem:[%s1267_s2 + $0x140] sm:$0xff]   ;;  %v982_v45 = vld [vmem:[%s1267_s2 + $0x148] sm:$0xff]   ;;  %v986_v49 = vld [vmem:[%s1267_s2 + $0x150] sm:$0xff]  }
   0xe   :  { %884 = vmatprep.subr.bf16.mxu1 %v959_v14  ;;  %619 = vmatprep.mubr.bf16.mxu0 %v785_v37  ;;  %v979_v42 = vld [vmem:[%s1267_s2 + $0x1c0] sm:$0xff]   ;;  %v983_v46 = vld [vmem:[%s1267_s2 + $0x1c8] sm:$0xff]   ;;  %v987_v50 = vld [vmem:[%s1267_s2 + $0x1d0] sm:$0xff]  }
   0xf   :  { %660 = vmatprep.mubr.bf16.mxu1 %v787_v40  ;;  %v980_v43 = vld [vmem:[%s1267_s2 + $0x100] sm:$0xff]   ;;  %v984_v47 = vld [vmem:[%s1267_s2 + $0x108] sm:$0xff]   ;;  %v988_v51 = vld [vmem:[%s1267_s2 + $0x110] sm:$0xff]  }
  0x10   :  { %863 = vmatpush3.bf16.msra.mxu0 %v960_v15  ;;  %v981_v44 = vld [vmem:[%s1267_s2 + $0x180] sm:$0xff]   ;;  %v985_v48 = vld [vmem:[%s1267_s2 + $0x188] sm:$0xff]   ;;  %v989_v52 = vld [vmem:[%s1267_s2 + $0x190] sm:$0xff]  }
  0x11   :  { %885 = vmatpush3.bf16.msra.mxu1 %v961_v16  ;;  %864 = vmatprep.subr.bf16.mxu0 %v962_v17  ;;  %v990_v53 = vld [vmem:[%s1267_s2 + $0x158] sm:$0xff]   ;;  %v994_v57 = vld [vmem:[%s1267_s2 + $0x160] sm:$0xff]   ;;  %v998_v61 = vld [vmem:[%s1267_s2 + $0x168] sm:$0xff]  }
  0x12   :  { %886 = vmatprep.subr.bf16.mxu1 %v963_v18  ;;  %v991_v54 = vld [vmem:[%s1267_s2 + $0x1d8] sm:$0xff]   ;;  %v995_v58 = vld [vmem:[%s1267_s2 + $0x1e0] sm:$0xff]   ;;  %v999_v62 = vld [vmem:[%s1267_s2 + $0x1e8] sm:$0xff]  }
  0x13   :  { %v992_v55 = vld [vmem:[%s1267_s2 + $0x118] sm:$0xff]   ;;  %v996_v59 = vld [vmem:[%s1267_s2 + $0x120] sm:$0xff]   ;;  %v1000_v63 = vld [vmem:[%s1267_s2 + $0x128] sm:$0xff]  }
  0x14   :  { %865 = vmatpush3.bf16.msra.mxu0 %v964_v19  ;;  %v993_v56 = vld [vmem:[%s1267_s2 + $0x198] sm:$0xff]   ;;  %v997_v60 = vld [vmem:[%s1267_s2 + $0x1a0] sm:$0xff]   ;;  %v1001_v0 = vld [vmem:[%s1267_s2 + $0x1a8] sm:$0xff]  }
  0x15   :  { %887 = vmatpush3.bf16.msra.mxu1 %v965_v20  ;;  %866 = vmatprep.subr.bf16.mxu0 %v966_v21  ;;  %v1002_v1 = vld [vmem:[%s1267_s2 + $0x170] sm:$0xff]   ;;  %v1006_v5 = vld [vmem:[%s1267_s2 + $0x178] sm:$0xff]   ;;  %v152_v15 = vld [vmem:[%s1269_s1 + $0x8] sm:$0x3] }
  0x16   :  { %888 = vmatprep.subr.bf16.mxu1 %v967_v22  ;;  %v1003_v2 = vld [vmem:[%s1267_s2 + $0x1f0] sm:$0xff]   ;;  %v1007_v6 = vld [vmem:[%s1267_s2 + $0x1f8] sm:$0xff]   ;;  %160 = vperm.xlu0 %945, %v152_v15   ;;  %v151_v18 = vld [vmem:[%s1269_s1] sm:$0xff] }
  0x17   :  { %v1004_v3 = vld [vmem:[%s1267_s2 + $0x130] sm:$0xff]   ;;  %v1008_v7 = vld [vmem:[%s1267_s2 + $0x138] sm:$0xff]  }
  0x18   :  { %867 = vmatpush3.bf16.msra.mxu0 %v968_v23  ;;  %v1005_v4 = vld [vmem:[%s1267_s2 + $0x1b0] sm:$0xff]   ;;  %v1009_v8 = vld [vmem:[%s1267_s2 + $0x1b8] sm:$0xff]  }
  0x19   :  { %889 = vmatpush3.bf16.msra.mxu1 %v969_v24  ;;  %868 = vmatprep.subr.bf16.mxu0 %v970_v25  ;;  %v17_v9 = vld [vmem:[%s1268_s0 + $0x10] sm:$0xff]  ;;  %v18_v13 = vld [vmem:[%s1268_s0 + $0x18] sm:$0xff] }
  0x1a   :  { %890 = vmatprep.subr.bf16.mxu1 %v971_v26  ;;  %v21_v10 = vld [vmem:[%s1268_s0 + $0x30] sm:$0x11]  ;;  %v22_v14 = vld [vmem:[%s1268_s0 + $0x38] sm:$0x11]  ;;  %155 = vperm.xlu0 %945, %v151_v18  }
  0x1b   :  { %v788_v11 = vcombine.low %v17_v9, %v21_v10  ;;  %v789_v12 = vcombine.high %v17_v9, %v21_v10  ;;  %v790_v16 = vcombine.low %v18_v13, %v22_v14  ;;  %v791_v17 = vcombine.high %v18_v13, %v22_v14 }
  0x1c   :  { %869 = vmatpush3.bf16.msra.mxu0 %v972_v27 }
  0x1d   :  { %891 = vmatpush3.bf16.msra.mxu1 %v973_v28  ;;  %870 = vmatprep.subr.bf16.mxu0 %v974_v29 }
  0x1e   :  { %892 = vmatprep.subr.bf16.mxu1 %v975_v30 }
  0x20   :  { %871 = vmatpush3.bf16.msra.mxu0 %v976_v31 }
  0x21   :  { %893 = vmatpush3.bf16.msra.mxu1 %v977_v32  ;;  %900 = vmatprep.subr.bf16.mxu0 %v978_v41 }
  0x22   :  { %922 = vmatprep.subr.bf16.mxu1 %v979_v42 }
  0x23   :  { %620 = vmatmul.mubr.bf16.vlgmr.msra.gmra.mrb[0].mxu0 %v784_v36 }
  0x24   :  { %661 = vmatmul.mubr.bf16.vlgmr.msra.gmra.mrb[0].mxu1 %v786_v39  ;;  %901 = vmatpush3.bf16.msra.mxu0 %v980_v43 }
  0x25   :  { %923 = vmatpush3.bf16.msra.mxu1 %v981_v44  ;;  %902 = vmatprep.subr.bf16.mxu0 %v982_v45 }
  0x26   :  { %924 = vmatprep.subr.bf16.mxu1 %v983_v46  ;;  %701 = vmatprep.mubr.bf16.mxu0 %v789_v12 }
  0x27   :  { %742 = vmatprep.mubr.bf16.mxu1 %v791_v17 }
  0x28   :  { %903 = vmatpush3.bf16.msra.mxu0 %v984_v47 }
  0x29   :  { %925 = vmatpush3.bf16.msra.mxu1 %v985_v48  ;;  %904 = vmatprep.subr.bf16.mxu0 %v986_v49 }
  0x2a   :  { %926 = vmatprep.subr.bf16.mxu1 %v987_v50 }
  0x2c   :  { %905 = vmatpush3.bf16.msra.mxu0 %v988_v51 }
  0x2d   :  { %927 = vmatpush3.bf16.msra.mxu1 %v989_v52  ;;  %906 = vmatprep.subr.bf16.mxu0 %v990_v53 }
  0x2e   :  { %928 = vmatprep.subr.bf16.mxu1 %v991_v54 }
  0x30   :  { %907 = vmatpush3.bf16.msra.mxu0 %v992_v55 }
  0x31   :  { %929 = vmatpush3.bf16.msra.mxu1 %v993_v56  ;;  %908 = vmatprep.subr.bf16.mxu0 %v994_v57 }
  0x32   :  { %930 = vmatprep.subr.bf16.mxu1 %v995_v58 }
  0x34   :  { %909 = vmatpush3.bf16.msra.mxu0 %v996_v59 }
  0x35   :  { %931 = vmatpush3.bf16.msra.mxu1 %v997_v60  ;;  %910 = vmatprep.subr.bf16.mxu0 %v998_v61 }
  0x36   :  { %932 = vmatprep.subr.bf16.mxu1 %v999_v62 }
  0x38   :  { %911 = vmatpush3.bf16.msra.mxu0 %v1000_v63 }
  0x39   :  { %933 = vmatpush3.bf16.msra.mxu1 %v1001_v0  ;;  %912 = vmatprep.subr.bf16.mxu0 %v1002_v1 }
  0x3a   :  { %934 = vmatprep.subr.bf16.mxu1 %v1003_v2 }
  0x3c   :  { %913 = vmatpush3.bf16.msra.mxu0 %v1004_v3 }
  0x3d   :  { %935 = vmatpush3.bf16.msra.mxu1 %v1005_v4  ;;  %914 = vmatprep.subr.bf16.mxu0 %v1006_v5 }
  0x3e   :  { %936 = vmatprep.subr.bf16.mxu1 %v1007_v6 }
  0x40   :  { %915 = vmatpush3.bf16.msra.mxu0 %v1008_v7 }
  0x41   :  { %937 = vmatpush3.bf16.msra.mxu1 %v1009_v8 }
  0x43   :  { %702 = vmatmul.mubr.bf16.vlgmr.msra.gmra.mrb[4].mxu0 %v788_v11 }
  0x44   :  { %743 = vmatmul.mubr.bf16.vlgmr.msra.gmra.mrb[4].mxu1 %v790_v16 }
  0x95   :  { %v161_v19 = vpop.permute.xlu0 %160 }
  0x99   :  { %v156_v21 = vpop.permute.xlu0 %155 }
  0xf6   :  { %v872_v20 = vpop.f32.mrb[0].mxu0 }
  0xf7   :  { %v894_v22 = vpop.f32.mrb[0].mxu1  ;;  %v873_v23 = vpop.f32.mrb[1].mxu0 }
  0xf8   :  { %v874_v24 = vadd.f32 %v873_v23, %v872_v20  ;;  %v895_v25 = vpop.f32.mrb[1].mxu1  ;;  %v875_v26 = vpop.f32.mrb[2].mxu0 }
  0xf9   :  { %v896_v27 = vadd.f32 %v895_v25, %v894_v22  ;;  %v897_v28 = vpop.f32.mrb[2].mxu1  ;;  %v876_v29 = vpop.f32.mrb[3].mxu0 }
  0xfa   :  { %v622_v30 = vadd.f32 %v874_v24, %v156_v21  ;;  %v877_v31 = vadd.f32 %v876_v29, %v875_v26  ;;  %v898_v32 = vpop.f32.mrb[3].mxu1 }
  0xfb   :  { %v899_v33 = vadd.f32 %v898_v32, %v897_v28 }
  0xfc   :  { %v663_v34 = vadd.f32 %v896_v27, %v622_v30  ;;  %v625_v35 = vadd.f32 %v877_v31, %v161_v19 }
  0xfe   :  { %v666_v36 = vadd.f32 %v899_v33, %v625_v35 }
 0x116   :  { %v916_v37 = vpop.f32.mrb[4].mxu0 }
 0x117   :  { %v938_v38 = vpop.f32.mrb[4].mxu1  ;;  %v917_v39 = vpop.f32.mrb[5].mxu0 }
 0x118   :  { %v918_v40 = vadd.f32 %v917_v39, %v916_v37  ;;  %v939_v41 = vpop.f32.mrb[5].mxu1  ;;  %v919_v42 = vpop.f32.mrb[6].mxu0 }
 0x119   :  { %v940_v43 = vadd.f32 %v939_v41, %v938_v38  ;;  %v941_v44 = vpop.f32.mrb[6].mxu1  ;;  %v920_v45 = vpop.f32.mrb[7].mxu0 }
 0x11a   :  { %v704_v46 = vadd.f32 %v918_v40, %v663_v34  ;;  %v921_v47 = vadd.f32 %v920_v45, %v919_v42  ;;  %v942_v48 = vpop.f32.mrb[7].mxu1 }
 0x11b   :  { %v943_v49 = vadd.f32 %v942_v48, %v941_v44 }
 0x11c   :  { %v745_v50 = vadd.f32 %v940_v43, %v704_v46  ;;  %v707_v51 = vadd.f32 %v921_v47, %v666_v36 }
 0x11e   :  { %v748_v52 = vadd.f32 %v943_v49, %v707_v51 }
 0x120   :  { %v752_v53 = vsel %vm751_vm0, %v748_v52, -inf }
 0x121   :  { %v753_v54 = vmax.f32 %v745_v50, %v752_v53 }
 0x123   :  { %v754_v55 = vrot.slane %v753_v54, 4 }
 0x125   :  { %v755_v56 = vmax.f32 %v753_v54, %v754_v55 }
 0x127   :  { %v756_v57 = vrot.slane %v755_v56, 2 }
 0x129   :  { %v757_v58 = vmax.f32 %v755_v56, %v756_v57 }
 0x12b   :  { %v758_v59 = vrot.slane %v757_v58, 1 }
 0x12d   :  { %v759_v60 = vmax.f32 %v757_v58, %v758_v59 }
 0x12f   :  { %v760_v61 = vsub.f32 %v745_v50, %v759_v60  ;;  %v761_v62 = vsub.f32 %v748_v52, %v759_v60 }
 0x131   :  { %v762_v63 = vmul.f32 1.442695, %v760_v61  ;;  %v764_v0 = vmul.f32 1.442695, %v761_v62 }
 0x133   :  { %1010 = vpow2.f32 %v762_v63 }
 0x134   :  { %1012 = vpow2.f32 %v764_v0 }
 0x13d   :  { %v1011_v1 = vpop.eup %1010 }
 0x13e   :  { %v1013_v2 = vpop.eup %1012 }
 0x13f   :  { %v766_v3 = vsel %vm751_vm0, %v1013_v2, 0.0 }
 0x140   :  { %v767_v4 = vadd.f32 %v1011_v1, %v766_v3 }
 0x142   :  { %v768_v5 = vrot.slane %v767_v4, 4 }
 0x144   :  { %v769_v6 = vadd.f32 %v768_v5, %v767_v4 }
 0x146   :  { %v770_v7 = vrot.slane %v769_v6, 2 }
 0x148   :  { %v771_v8 = vadd.f32 %v770_v7, %v769_v6 }
 0x14a   :  { %v772_v9 = vrot.slane %v771_v8, 1 }
 0x14c   :  { %v773_v10 = vadd.f32 %v772_v9, %v771_v8 }
 0x14e   :  { %1014 = vlog2.f32 %v773_v10 }
 0x158   :  { %v1015_v11 = vpop.eup %1014 }
 0x159   :  { %v775_v12 = vmul.f32 0.6931472, %v1015_v11 }
 0x15b   :  { %v776_v13 = vsub.f32 %v760_v61, %v775_v12  ;;  %v777_v14 = vsub.f32 %v761_v62, %v775_v12 }
 0x15d   :  { %778 = vst [vmem:[%s1270_s3] sm:$0xff] %v776_v13  ;;  %779 = vst [vmem:[%s1270_s3 + $0x8] sm:$0x3] %v777_v14 }

</bundles_post_ra>
